<compile_context>
chip_gen: v7x
topology: tpu7x:2x2x1
jax: 0.10.0
libtpu: 0.0.40
codegen_flags: <defaults>
</compile_context>

<pallas_src>
import functools
import math

import jax
import jax.numpy as jnp
from jax.experimental import pallas as pl
from jax.experimental.pallas import tpu as pltpu

HIDDEN = 1024


def _default_hidden_dtype():
    """bf16 hidden activations on chips with bf16-native VPU/EUP (v6e, v7x); f32 otherwise."""
    try:
        kind = jax.devices()[0].device_kind.lower()
    except Exception:
        return jnp.float32
    if "v6" in kind or "v7" in kind:
        return jnp.bfloat16
    return jnp.float32           # v5e (and older / unknown): no bf16 VPU/EUP


def _gamma_tilde_kernel(scal_ref, w_ref, t_ref, out_ref, *, hidden_dtype):
    """
    One (TN, 1) row-tile of timesteps -> gamma_tilde(t).

    scal_ref : SMEM (4,) f32 = [softplus(w1), b1, c3, 0]
    w_ref    : VMEM (8, H) f32, resident; rows:
                 0: a   = 0.5 * softplus(w2) * softplus(w1)
                 1: c   = 0.5 * (softplus(w2) * b1 + b2)
                 2: w3h = 0.5 * softplus(w3)
    t_ref    : VMEM (TN, 1) f32
    out_ref  : VMEM (TN, 1) f32
    """
    w1p = scal_ref[0]
    b1 = scal_ref[1]
    c3 = scal_ref[2]

    t = t_ref[...]                                   # (TN, 1) f32
    l1_t = w1p * t + b1                              # PositiveLinear l1, f32 (epilogue term)

    a = w_ref[0:1, :].astype(hidden_dtype)           # tiny (1,H) casts; no-ops on the f32 path
    c = w_ref[1:2, :].astype(hidden_dtype)
    w3h = w_ref[2:3, :].astype(hidden_dtype)

    # sigmoid(x) = 0.5*tanh(0.5*x) + 0.5; the 0.5's and l1's affine are pre-folded into
    # a/c/w3h/c3, so per hidden element this is one FMA (hidden dtype) + one EUP tanh.
    pre = t.astype(hidden_dtype) * a + c             # (TN, H)
    th = jnp.tanh(pre)                               # (TN, H) — EUP, the binding unit

    if jnp.dtype(hidden_dtype) == jnp.dtype(jnp.float32):
        # f32 path: exact f32 accumulation via VPU multiply + lane reduce (XLU),
        # independent of the MXU's f32 emulation precision.
        l3 = jnp.sum(th * w3h.astype(jnp.float32), axis=-1, keepdims=True) + c3
    else:
        # bf16 fast path: H-contraction on the MXU, f32 accumulation (required — bf16
        # accumulation over H=1024 would be amplified by the normalization constant).
        l3 = jax.lax.dot_general(
            th, w3h, (((1,), (1,)), ((), ())),
            preferred_element_type=jnp.float32) + c3  # (TN, 1) f32

    out_ref[...] = l1_t + l3                          # gamma_tilde(t)


def _pallas_gamma_tilde(t2d, scal, wpack, *, hidden_dtype, block_rows):
    """Row-tiled pallas_call computing gamma_tilde(t) for t of shape (N, 1) f32."""
    n = t2d.shape[0]

    # Row tile: multiple of 8 (sublane); small batches collapse to a single tile.
    tn = min(int(block_rows), ((n + 7) // 8) * 8)
    tn = max(8, (tn // 8) * 8)
    n_pad = ((n + tn - 1) // tn) * tn
    if n_pad != n:
        t2d = jnp.pad(t2d, ((0, n_pad - n), (0, 0)))   # padded rows (t=0) sliced off below
    grid = (n_pad // tn,)

    # Explicit scoped-VMEM budget: (TN,H) activation temporaries + lane-padded (TN,1)
    # t/out double-buffers + resident weights + compiler slack; never below 32 MiB and
    # capped below v7x's 64 MiB physical VMEM (v5e's default scoped limit is only 16 MiB).
    item = jnp.dtype(hidden_dtype).itemsize
    vmem_limit = int(min(
        56 << 20,
        max(32 << 20,
            3 * tn * HIDDEN * item        # pre / tanh / contraction temporaries
            + 4 * tn * 128 * 4            # double-buffered (TN,1) t/out tiles (lane-padded)
            + 2 * 8 * HIDDEN * 4          # resident packed weights
            + (8 << 20))))                # headroom for compiler-internal scratch

    out = pl.pallas_call(
        functools.partial(_gamma_tilde_kernel, hidden_dtype=hidden_dtype),
        out_shape=jax.ShapeDtypeStruct((n_pad, 1), jnp.float32),
        grid=grid,
        in_specs=[
            pl.BlockSpec(memory_space=pltpu.MemorySpace.SMEM),   # folded scalars
            pl.BlockSpec((8, HIDDEN), lambda i: (0, 0)),         # packed weights (resident)
            pl.BlockSpec((tn, 1), lambda i: (i, 0)),             # t row tile
        ],
        # TODO(synk): a lane-dense (.., 128)-wide out layout would avoid masked vst.msk
        # stores; modest win while EUP-bound, revisit if per-tile compute shrinks further.
        out_specs=pl.BlockSpec((tn, 1), lambda i: (i, 0)),
        compiler_params=pltpu.CompilerParams(
            # TODO(synk): confirm on a v7x trace that both TensorCores are busy; if not,
            # switch this axis to pltpu.CORE_PARALLEL (no effect on single-TC v5e/v6e).
            dimension_semantics=("parallel",),
            vmem_limit_bytes=vmem_limit,
        ),
        cost_estimate=pl.CostEstimate(
            flops=4 * n_pad * HIDDEN,
            transcendentals=n_pad * HIDDEN,
            bytes_accessed=8 * n_pad + 4 * 8 * HIDDEN + 16,
        ),
    )(scal, wpack, t2d)
    return out[:n]


def gamma_network_pallas(t, params, *, hidden_dtype=None, block_rows=1024):
    """gamma(t) for t of shape (N, 1) (or (N,)) float32.

    hidden_dtype: None -> auto (bf16 on v6e/v7x, f32 on v5e); may be forced to
                  jnp.float32 (reference accuracy everywhere) or jnp.bfloat16.
    block_rows:   row-tile size (rounded down to a multiple of 8); 1024-2048 for large N.
    """
    if hidden_dtype is None:
        hidden_dtype = _default_hidden_dtype()

    t = jnp.asarray(t, jnp.float32)
    squeeze = (t.ndim == 1)
    if squeeze:
        t = t[:, None]
    n = t.shape[0]

    sp = jax.nn.softplus

    # ---- hoisted, parameter-only work (once per call, never per row tile) ----
    w1p = sp(jnp.asarray(params["w1"], jnp.float32))          # scalar, softplus-positive
    w2p = sp(jnp.asarray(params["w2t"], jnp.float32))         # (1, H)
    w3p = sp(jnp.asarray(params["w3t"], jnp.float32))         # (1, H)
    b1 = jnp.asarray(params["b1"], jnp.float32)
    b2 = jnp.asarray(params["b2"], jnp.float32).reshape(1, HIDDEN)
    b3 = jnp.asarray(params["b3"], jnp.float32)

    # sigmoid(x) = 0.5*tanh(0.5*x) + 0.5 with l1's affine folded per hidden unit:
    #   0.5*(w2p_h*(w1p*t + b1) + b2_h) = a_h*t + c_h
    a = 0.5 * w2p * w1p                                       # (1, H)
    c = 0.5 * (w2p * b1 + b2)                                 # (1, H)
    w3h = 0.5 * w3p                                           # (1, H)
    c3 = 0.5 * jnp.sum(w3p) + b3                              # scalar

    wpack = jnp.zeros((8, HIDDEN), jnp.float32)
    wpack = wpack.at[0, :].set(a[0])
    wpack = wpack.at[1, :].set(c[0])
    wpack = wpack.at[2, :].set(w3h[0])

    scal = jnp.stack([w1p, b1, c3, jnp.float32(0.0)]).astype(jnp.float32)

    # Append t=0 and t=1 so gamma_tilde(0) / gamma_tilde(1) come from the SAME kernel
    # launch (same hidden precision) — no second pallas_call; fold normalization after.
    t_aug = jnp.concatenate([t, jnp.array([[0.0], [1.0]], jnp.float32)], axis=0)
    gt = _pallas_gamma_tilde(t_aug, scal, wpack,
                             hidden_dtype=hidden_dtype, block_rows=block_rows)
    gt_t, gt_0, gt_1 = gt[:n], gt[n, 0], gt[n + 1, 0]

    g0 = jnp.asarray(params["gamma_0"], jnp.float32)
    g1 = jnp.asarray(params["gamma_1"], jnp.float32)
    c1 = (g1 - g0) / (gt_1 - gt_0)
    out = g0 + c1 * (gt_t - gt_0)
    return out[:, 0] if squeeze else out


def init_params(key):
    """Deterministic init mirroring PositiveLinear.reset_parameters
    (kaiming_uniform(a=sqrt(5)) => U(-1/sqrt(fan_in), 1/sqrt(fan_in)), then weight -= 2)."""
    k1, k2, k3, k4, k5, k6 = jax.random.split(key, 6)

    # l1: 1 -> 1, fan_in = 1
    w1 = jax.random.uniform(k1, (), jnp.float32, -1.0, 1.0) - 2.0
    b1 = jax.random.uniform(k2, (), jnp.float32, -1.0, 1.0)

    # l2: 1 -> 1024, fan_in = 1  (stored transposed: (1, H))
    w2t = jax.random.uniform(k3, (1, HIDDEN), jnp.float32, -1.0, 1.0) - 2.0
    b2 = jax.random.uniform(k4, (1, HIDDEN), jnp.float32, -1.0, 1.0)

    # l3: 1024 -> 1, fan_in = 1024, bound = 1/sqrt(1024)
    bnd = 1.0 / math.sqrt(HIDDEN)
    w3t = jax.random.uniform(k5, (1, HIDDEN), jnp.float32, -bnd, bnd) - 2.0
    b3 = jax.random.uniform(k6, (), jnp.float32, -bnd, bnd)

    return {
        "w1": w1, "b1": b1, "w2t": w2t, "b2": b2, "w3t": w3t, "b3": b3,
        "gamma_0": jnp.float32(-5.0), "gamma_1": jnp.float32(10.0),
    }


def gamma_network_ref(t, p):
    """Pure-JAX f32 reference for correctness checking."""
    sp = jax.nn.softplus

    def gamma_tilde(tt):
        l1 = sp(p["w1"]) * tt + p["b1"]                       # (M, 1)
        h = jax.nn.sigmoid(l1 @ sp(p["w2t"]) + p["b2"])       # (M, H)
        l3 = h @ sp(p["w3t"]).T + p["b3"]                     # (M, 1)
        return l1 + l3

    gt_t = gamma_tilde(t)
    gt_0 = gamma_tilde(jnp.zeros_like(t))
    gt_1 = gamma_tilde(jnp.ones_like(t))
    normalized = (gt_t - gt_0) / (gt_1 - gt_0)
    return p["gamma_0"] + (p["gamma_1"] - p["gamma_0"]) * normalized


if __name__ == "__main__":
    key = jax.random.PRNGKey(0)
    pkey, tkey = jax.random.split(key)
    params = init_params(pkey)

    # Timestep batch (N, 1).
    N = 200
    t = jax.random.uniform(tkey, (N, 1), jnp.float32, 0.0, 1.0)

    ref = jax.block_until_ready(gamma_network_ref(t, params))

    # f32 hidden path (v5e default; reference accuracy everywhere), single 208-row tile.
    out_f32 = jax.block_until_ready(
        gamma_network_pallas(t, params, hidden_dtype=jnp.float32, block_rows=256))
    assert out_f32.shape == (N, 1)
    assert bool(jnp.all(jnp.isfinite(out_f32)))
    assert jnp.allclose(out_f32, ref, atol=5e-4, rtol=5e-4), (out_f32, ref)

    # Multi-tile grid exercise (2 row tiles), same math / same tolerance.
    out_multi = jax.block_until_ready(
        gamma_network_pallas(t, params, hidden_dtype=jnp.float32, block_rows=128))
    assert jnp.allclose(out_multi, ref, atol=5e-4, rtol=5e-4)

    # bf16 hidden path (v6e/v7x fast path: bf16 VPU FMA + bf16 EUP tanh + MXU f32-acc dot).
    # The (gamma_1-gamma_0)/(gt(1)-gt(0)) normalization amplifies hidden-precision noise by
    # ~O(10x) at this init, so only a coarse agreement check vs. the f32 kernel is made.
    out_bf16 = jax.block_until_ready(
        gamma_network_pallas(t, params, hidden_dtype=jnp.bfloat16, block_rows=256))
    assert out_bf16.shape == (N, 1)
    assert bool(jnp.all(jnp.isfinite(out_bf16)))
    assert float(jnp.max(jnp.abs(out_bf16 - out_f32))) < 2.0

    # Auto-dispatched default (f32 on v5e, bf16 on v6e/v7x) with default block_rows.
    out_auto = jax.block_until_ready(gamma_network_pallas(t, params))
    assert out_auto.shape == (N, 1)
    assert bool(jnp.all(jnp.isfinite(out_auto)))

    print("KERNEL_OK")
</pallas_src>

<mosaic_0001>
module attributes {stable_mosaic.version = 11 : i64} {
  func.func @_gamma_tilde_kernel(%arg0: i32, %arg1: memref<4xf32, #tpu.memory_space<smem>>, %arg2: memref<8x1024xf32, #tpu.memory_space<vmem>>, %arg3: memref<208x1xf32, #tpu.memory_space<vmem>>, %arg4: memref<208x1xf32, #tpu.memory_space<vmem>>) attributes {dimension_semantics = [#tpu.dimension_semantics<parallel>], iteration_bounds = array<i64: 1>, scalar_prefetch = 0 : i64, scratch_operands = 0 : i64, tpu.core_type = #tpu.core_type<tc>, window_params = [{transform_indices = @transform_0, window_bounds = array<i64: 4>}, {pipeline_mode = #tpu.pipeline_mode<synchronous>, transform_indices = @transform_1, window_bounds = array<i64: 8, 1024>}, {transform_indices = @transform_2, window_bounds = array<i64: 208, 1>}, {transform_indices = @transform_3, window_bounds = array<i64: 208, 1>}]} {
    %c0 = arith.constant 0 : index
    %0 = memref.load %arg1[%c0] : memref<4xf32, #tpu.memory_space<smem>>
    %c1 = arith.constant 1 : index
    %1 = memref.load %arg1[%c1] : memref<4xf32, #tpu.memory_space<smem>>
    %c2 = arith.constant 2 : index
    %2 = memref.load %arg1[%c2] : memref<4xf32, #tpu.memory_space<smem>>
    %c0_0 = arith.constant 0 : index
    %c0_1 = arith.constant 0 : index
    %3 = vector.load %arg3[%c0_0, %c0_1] : memref<208x1xf32, #tpu.memory_space<vmem>>, vector<208x1xf32>
    %4 = vector.broadcast %0 : f32 to vector<208x1xf32>
    %5 = arith.mulf %4, %3 : vector<208x1xf32>
    %6 = vector.broadcast %1 : f32 to vector<208x1xf32>
    %7 = arith.addf %5, %6 : vector<208x1xf32>
    %c0_2 = arith.constant 0 : index
    %c0_3 = arith.constant 0 : index
    %8 = vector.load %arg2[%c0_2, %c0_3] : memref<8x1024xf32, #tpu.memory_space<vmem>>, vector<1x1024xf32>
    %c1_4 = arith.constant 1 : index
    %c0_5 = arith.constant 0 : index
    %9 = vector.load %arg2[%c1_4, %c0_5] : memref<8x1024xf32, #tpu.memory_space<vmem>>, vector<1x1024xf32>
    %c2_6 = arith.constant 2 : index
    %c0_7 = arith.constant 0 : index
    %10 = vector.load %arg2[%c2_6, %c0_7] : memref<8x1024xf32, #tpu.memory_space<vmem>>, vector<1x1024xf32>
    %11 = vector.broadcast %3 : vector<208x1xf32> to vector<208x1024xf32>
    %12 = vector.broadcast %8 : vector<1x1024xf32> to vector<208x1024xf32>
    %13 = arith.mulf %11, %12 : vector<208x1024xf32>
    %14 = vector.broadcast %9 : vector<1x1024xf32> to vector<208x1024xf32>
    %15 = arith.addf %13, %14 : vector<208x1024xf32>
    %16 = math.tanh %15 : vector<208x1024xf32>
    %17 = vector.broadcast %10 : vector<1x1024xf32> to vector<208x1024xf32>
    %18 = arith.mulf %16, %17 : vector<208x1024xf32>
    %cst = arith.constant dense<0.000000e+00> : vector<208xf32>
    %19 = vector.multi_reduction <add>, %18, %cst [1] : vector<208x1024xf32> to vector<208xf32>
    %20 = vector.shape_cast %19 : vector<208xf32> to vector<208x1xf32>
    %21 = vector.broadcast %2 : f32 to vector<208x1xf32>
    %22 = arith.addf %20, %21 : vector<208x1xf32>
    %23 = arith.addf %7, %22 : vector<208x1xf32>
    %c0_8 = arith.constant 0 : index
    %c0_9 = arith.constant 0 : index
    %24 = vector.load %arg4[%c0_8, %c0_9] : memref<208x1xf32, #tpu.memory_space<vmem>>, vector<208x1xf32>
    tpu.vector_store %arg4[%c0_8, %c0_9], %23 {strides = array<i32>} : memref<208x1xf32, #tpu.memory_space<vmem>>, vector<208x1xf32>,
    return
  }
  func.func @transform_0(%arg0: i32) -> i32 {
    %c0_i32 = arith.constant 0 : i32
    %c0_i32_0 = arith.constant 0 : i32
    return %c0_i32 : i32
  }
  func.func @transform_1(%arg0: i32) -> (i32, i32) {
    %c0_i32 = arith.constant 0 : i32
    %c0_i32_0 = arith.constant 0 : i32
    %c0_i32_1 = arith.constant 0 : i32
    return %c0_i32, %c0_i32_0 : i32, i32
  }
  func.func @transform_2(%arg0: i32) -> (i32, i32) {
    %c0_i32 = arith.constant 0 : i32
    %c0_i32_0 = arith.constant 0 : i32
    return %arg0, %c0_i32 : i32, i32
  }
  func.func @transform_3(%arg0: i32) -> (i32, i32) {
    %c0_i32 = arith.constant 0 : i32
    %c0_i32_0 = arith.constant 0 : i32
    return %arg0, %c0_i32 : i32, i32
  }
}

</mosaic_0001>

<bundles_post_ra>
// kernel: tpu_custom_call.1
= control target key start
LH: loop header
LB: loop body
LE: loop exit
PB: predicated region body
PF: predicated region fallthrough
CT: control target
= control target key end

     0   :  { %8 = vsyncpa [#allocation3], 0  ;;  %s3975_s0 = inlined_call_operand.vmem [shape: f32[4], index: 0, kind: input, shape index: {}]   ;;  %s3976_s1 = inlined_call_operand.vmem [shape: f32[8,1024], index: 1, kind: input, shape index: {}]   ;;  %s3977_s2 = inlined_call_operand.vmem [shape: f32[208,1], index: 2, kind: input, shape index: {}]   ;;  %s3978_s3 = inlined_call_operand.vmem [shape: f32[208,1], index: 3, kind: output, shape index: {}]  }
   0x1   :  { %s15_s14 = sshll.u32 %s3975_s0, 4  ;;  %s16_s14 = int_to_ptr.vmem [resolvable:$true] %s15_s14 }
   0x2   :  { %s1958_s15 = scalar_lea.vmem %s16_s14, 16  ;;  %p1963_p1 = scmp.lt.s32.totalorder %s16_s14, %s16_s14 }
   0x3   :  { %p1959_p0 = scmp.ne.s32.totalorder %s16_s14, %s1958_s15  ;;  %p1964_p2 = scmp.lt.s32.totalorder %s1958_s15, %s1958_s15 }
   0x5   :  { %p1965_p3 = por %p1964_p2, %p1963_p1 }
   0x7   :  { %p1966_p4 = pnand %p1965_p3, %p1959_p0 }
   0x9   :  { %1969 = shalt.err (!%p1966_p4)
}
   0xa   :  { %s1972_s16 = smov [#allocation2]  }
   0xb   :  { %18 = dma.vmem_to_smem %s16_s14, 16, %s1972_s16, [#allocation3]  }
   0xc   :  { %1970 = dma.done.wait [#allocation3], 16  }
   0xd   :  { %1971 = vsyncadd [#allocation3], 4294967280 }
   0xe   :  { %26 = sfence }
   0xf   :  { %v2000_v0 = vld [vmem:[%s3977_s2 + $0x10] sm:$0xff]  ;;  %v1973_v1 = vmov 0   ;;  %s27_s0 = sld [smem:[#allocation2]]  ;;  %v2005_v2 = vld [vmem:[%s3977_s2] sm:$0xff]  ;;  %v33_v3 = vld [vmem:[%s3977_s2 + $0x18] sm:$0xff]  ;;  %v252_v44 = vlaneseq  ;;  %s1525_s14 = sld [smem:[#allocation2 + $0x1]] }
  0x10   :  { %1534 = vset.pattern.permute.xlu1 %v1973_v1  ;;  %1533 = vset.pattern.permute.xlu0 %v1973_v1  ;;  %v2015_v4 = vld [vmem:[%s3977_s2 + $0x8] sm:$0xff]  ;;  %v34_v6 = vld [vmem:[%s3977_s2 + $0x20] sm:$0xff]  ;;  %v41_v7 = vld [vmem:[%s3977_s2 + $0x58] sm:$0xff]  ;;  %vm1493_vm0 = vcmask 7168  }
  0x11   :  { %133 = vperm.xlu1 %1534, %v2000_v0   ;;  %123 = vperm.xlu0 %1533, %v2005_v2   ;;  %v35_v5 = vld [vmem:[%s3977_s2 + $0x28] sm:$0xff]  ;;  %v40_v8 = vld [vmem:[%s3977_s2 + $0x50] sm:$0xff]  ;;  %v37_v11 = vld [vmem:[%s3977_s2 + $0x38] sm:$0xff]  ;;  %v253_v45 = vshrl.u32 %v252_v44, 7 }
  0x12   :  { %v43_v9 = vld [vmem:[%s3977_s2 + $0x68] sm:$0xff]  ;;  %v36_v12 = vld [vmem:[%s3977_s2 + $0x30] sm:$0xff]  ;;  %v42_v13 = vld [vmem:[%s3977_s2 + $0x60] sm:$0xff] }
  0x13   :  { %v45_v14 = vld [vmem:[%s3977_s2 + $0x78] sm:$0xff]  ;;  %v44_v15 = vld [vmem:[%s3977_s2 + $0x70] sm:$0xff]  ;;  %v47_v19 = vld [vmem:[%s3977_s2 + $0x88] sm:$0xff]  ;;  %v254_v51 = vsub.s32 0, %v253_v45  ;;  %v258_v52 = vsub.s32 1, %v253_v45  ;;  %v262_v53 = vsub.s32 2, %v253_v45 }
  0x14   :  { %v46_v20 = vld [vmem:[%s3977_s2 + $0x80] sm:$0xff]  ;;  %v49_v21 = vld [vmem:[%s3977_s2 + $0x98] sm:$0xff]  ;;  %v48_v26 = vld [vmem:[%s3977_s2 + $0x90] sm:$0xff]  ;;  %v266_v54 = vsub.s32 3, %v253_v45  ;;  %v270_v55 = vsub.s32 4, %v253_v45  ;;  %v274_v56 = vsub.s32 5, %v253_v45 }
  0x15   :  { %138 = vperm.xlu1 %1534, %v33_v3   ;;  %128 = vperm.xlu0 %1533, %v2015_v4   ;;  %v2033_v10 = vstv %s27_s0  ;;  %v51_v27 = vld [vmem:[%s3977_s2 + $0xa8] sm:$0xff]  ;;  %v50_v28 = vld [vmem:[%s3977_s2 + $0xa0] sm:$0xff]  ;;  %v53_v33 = vld [vmem:[%s3977_s2 + $0xb8] sm:$0xff]  ;;  %v278_v61 = vsub.s32 6, %v253_v45  ;;  %v282_v62 = vsub.s32 7, %v253_v45 }
  0x16   :  { %4028 = vst [vmem:[#allocation5_spill] sm:$0xff] %v2033_v10  ;;  %v2051_v16 = vmul.f32 %v2033_v10, %v41_v7  ;;  %v2054_v17 = vmul.f32 %v2033_v10, %v40_v8  ;;  %v2057_v18 = vmul.f32 %v2033_v10, %v43_v9  ;;  %v2069_v22 = vmul.f32 %v2033_v10, %v42_v13  ;;  %v52_v34 = vld [vmem:[%s3977_s2 + $0xb0] sm:$0xff]  ;;  %v55_v35 = vld [vmem:[%s3977_s2 + $0xc8] sm:$0xff]  ;;  %v54_v40 = vld [vmem:[%s3977_s2 + $0xc0] sm:$0xff] }
  0x17   :  { %v2072_v23 = vmul.f32 %v2033_v10, %v45_v14  ;;  %v2075_v24 = vmul.f32 %v2033_v10, %v44_v15  ;;  %v2078_v25 = vmul.f32 %v2033_v10, %v47_v19  ;;  %v2090_v29 = vmul.f32 %v2033_v10, %v46_v20  ;;  %v39_v42 = vld [vmem:[%s3977_s2 + $0x48] sm:$0xff]  ;;  %v38_v43 = vld [vmem:[%s3977_s2 + $0x40] sm:$0xff] }
  0x18   :  { %4029 = vst [vmem:[#allocation6_spill] sm:$0xff] %v2051_v16  ;;  %4030 = vst [vmem:[#allocation7_spill] sm:$0xff] %v2054_v17  ;;  %v2093_v30 = vmul.f32 %v2033_v10, %v49_v21  ;;  %v2096_v31 = vmul.f32 %v2033_v10, %v48_v26  ;;  %v2099_v32 = vmul.f32 %v2033_v10, %v51_v27  ;;  %v110_v46 = vld [vmem:[%s3976_s1] ss:$8 sm:$0xf]  ;;  %v2152_v60 = vstv %s1525_s14 }
  0x19   :  { %148 = vperm.xlu1 %1534, %v35_v5   ;;  %143 = vperm.xlu0 %1533, %v34_v6   ;;  %4031 = vst [vmem:[#allocation8_spill] sm:$0xff] %v2057_v18  ;;  %4032 = vst [vmem:[#allocation9_spill] sm:$0xff] %v2069_v22  ;;  %v2111_v36 = vmul.f32 %v2033_v10, %v50_v28  ;;  %v2114_v37 = vmul.f32 %v2033_v10, %v53_v33  ;;  %v111_v47 = vld [vmem:[%s3976_s1] ss:$8 sm:$0xf0] }
  0x1a   :  { %4033 = vst [vmem:[#allocation10_spill] sm:$0xff] %v2072_v23  ;;  %4034 = vst [vmem:[#allocation11_spill] sm:$0xff] %v2075_v24  ;;  %v2117_v38 = vmul.f32 %v2033_v10, %v52_v34  ;;  %v2120_v39 = vmul.f32 %v2033_v10, %v55_v35  ;;  %v2126_v41 = vmul.f32 %v2033_v10, %v54_v40  ;;  %v1527_v48 = vld [vmem:[%s3976_s1 + $0x1] ss:$8 sm:$0xf] }
  0x1b   :  { %4035 = vst [vmem:[#allocation12_spill] sm:$0xff] %v2078_v25  ;;  %4036 = vst [vmem:[#allocation13_spill] sm:$0xff] %v2090_v29  ;;  %v1528_v49 = vld [vmem:[%s3976_s1 + $0x1] ss:$8 sm:$0xf0]  ;;  %v112_v50 = vor.u32 %v111_v47, %v110_v46  ;;  %v2156_v63 = vmul.f32 %v2033_v10, %v2000_v0  ;;  %v2160_v1 = vmul.f32 %v2033_v10, %v2005_v2 }
  0x1c   :  { %4037 = vst [vmem:[#allocation14_spill] sm:$0xff] %v2093_v30  ;;  %4038 = vst [vmem:[#allocation15_spill] sm:$0xff] %v2096_v31  ;;  %v116_v57 = vor.u32 %v1528_v49, %v1527_v48  ;;  %v1529_v58 = vld [vmem:[%s3976_s1 + $0x2] ss:$8 sm:$0xf]  ;;  %v2164_v3 = vmul.f32 %v2033_v10, %v2015_v4 }
  0x1d   :  { %4039 = vst [vmem:[#allocation16_spill] sm:$0xff] %v2099_v32  ;;  %4040 = vst [vmem:[#allocation17_spill] sm:$0xff] %v2111_v36  ;;  %158 = vperm.xlu1 %1534, %v37_v11   ;;  %153 = vperm.xlu0 %1533, %v36_v12   ;;  %v1530_v59 = vld [vmem:[%s3976_s1 + $0x2] ss:$8 sm:$0xf0]  ;;  %v2166_v5 = vrot.slane %v112_v50, %v254_v51  ;;  %v2168_v6 = vrot.slane %v112_v50, %v258_v52  ;;  %s3735_s1 = sld [smem:[#allocation2 + $0x2]] }
  0x1e   :  { %4041 = vst [vmem:[#allocation18_spill] sm:$0xff] %v2114_v37  ;;  %4042 = vst [vmem:[#allocation19_spill] sm:$0xff] %v2117_v38  ;;  %v2174_v11 = vrot.slane %v112_v50, %v270_v55  ;;  %v2176_v0 = vrot.slane %v112_v50, %v274_v56  ;;  %v2178_v12 = vrot.slane %v116_v57, %v254_v51 }
  0x1f   :  { %4043 = vst [vmem:[#allocation20_spill] sm:$0xff] %v2120_v39  ;;  %4044 = vst [vmem:[#allocation21_spill] sm:$0xff] %v2126_v41  ;;  %v2180_v2 = vrot.slane %v116_v57, %v258_v52  ;;  %v2184_v4 = vrot.slane %v116_v57, %v266_v54 }
  0x20   :  { %4045 = vst [vmem:[#allocation22_spill] sm:$0xff] %v2152_v60  ;;  %4046 = vst [vmem:[#allocation23_spill] sm:$0xff] %v2156_v63 }
  0x21   :  { %168 = vperm.xlu1 %1534, %v39_v42   ;;  %163 = vperm.xlu0 %1533, %v38_v43   ;;  %4047 = vst [vmem:[#allocation24_spill] sm:$0xff] %v2160_v1  ;;  %4048 = vst [vmem:[#allocation25_spill] sm:$0xff] %v2164_v3 }
  0x25   :  { %178 = vperm.xlu1 %1534, %v41_v7   ;;  %173 = vperm.xlu0 %1533, %v40_v8   ;;  %v2170_v7 = vrot.slane %v112_v50, %v262_v53  ;;  %v2172_v8 = vrot.slane %v112_v50, %v266_v54 }
  0x29   :  { %188 = vperm.xlu1 %1534, %v43_v9   ;;  %183 = vperm.xlu0 %1533, %v42_v13   ;;  %v120_v9 = vor.u32 %v1530_v59, %v1529_v58  ;;  %v2182_v13 = vrot.slane %v116_v57, %v262_v53 }
  0x2b   :  { %v2210_v42 = vrot.slane %v120_v9, %v270_v55  ;;  %v2212_v43 = vrot.slane %v120_v9, %v274_v56  ;;  %v2214_v44 = vrot.slane %v120_v9, %v278_v61  ;;  %v2216_v45 = vrot.slane %v120_v9, %v282_v62 }
  0x2d   :  { %198 = vperm.xlu1 %1534, %v45_v14   ;;  %193 = vperm.xlu0 %1533, %v44_v15   ;;  %v2186_v14 = vrot.slane %v112_v50, %v278_v61  ;;  %v2188_v15 = vrot.slane %v112_v50, %v282_v62  ;;  %4049 = vst [vmem:[#allocation26_spill] sm:$0xff] %v2210_v42  ;;  %4050 = vst [vmem:[#allocation27_spill] sm:$0xff] %v2212_v43 }
  0x2e   :  { %4051 = vst [vmem:[#allocation28_spill] sm:$0xff] %v2214_v44  ;;  %4052 = vst [vmem:[#allocation29_spill] sm:$0xff] %v2216_v45 }
  0x31   :  { %208 = vperm.xlu1 %1534, %v47_v19   ;;  %203 = vperm.xlu0 %1533, %v46_v20   ;;  %v2190_v19 = vrot.slane %v116_v57, %v270_v55  ;;  %v2192_v20 = vrot.slane %v116_v57, %v274_v56 }
  0x35   :  { %218 = vperm.xlu1 %1534, %v49_v21   ;;  %213 = vperm.xlu0 %1533, %v48_v26   ;;  %v2194_v21 = vrot.slane %v116_v57, %v278_v61  ;;  %v2196_v26 = vrot.slane %v116_v57, %v282_v62 }
  0x39   :  { %228 = vperm.xlu1 %1534, %v51_v27   ;;  %223 = vperm.xlu0 %1533, %v50_v28   ;;  %v2198_v27 = vrot.slane %v120_v9, %v254_v51  ;;  %v2200_v28 = vrot.slane %v120_v9, %v258_v52 }
  0x3d   :  { %238 = vperm.xlu1 %1534, %v53_v33   ;;  %233 = vperm.xlu0 %1533, %v52_v34   ;;  %v2202_v33 = vrot.slane %v120_v9, %v262_v53  ;;  %v2204_v34 = vrot.slane %v120_v9, %v266_v54 }
  0x41   :  { %248 = vperm.xlu1 %1534, %v55_v35   ;;  %243 = vperm.xlu0 %1533, %v54_v40  }
  0x90   :  { %v2206_v35 = vpop.permute.xlu1 %133  ;;  %v2208_v40 = vpop.permute.xlu0 %123 }
  0x91   :  { %v308_v46 = vmul.f32 %v2166_v5, %v2206_v35  ;;  %v309_v47 = vmul.f32 %v2168_v6, %v2206_v35  ;;  %v310_v48 = vmul.f32 %v2170_v7, %v2206_v35  ;;  %v311_v49 = vmul.f32 %v2172_v8, %v2206_v35 }
  0x92   :  { %v2228_v50 = vmul.f32 %v2174_v11, %v2206_v35  ;;  %v2232_v51 = vmul.f32 %v2176_v0, %v2206_v35  ;;  %v292_v52 = vmul.f32 %v2166_v5, %v2208_v40  ;;  %v293_v53 = vmul.f32 %v2168_v6, %v2208_v40 }
  0x93   :  { %v557_v54 = vadd.f32 %v2178_v12, %v308_v46  ;;  %v558_v55 = vadd.f32 %v2180_v2, %v309_v47  ;;  %v559_v56 = vadd.f32 %v2182_v13, %v310_v48  ;;  %v560_v57 = vadd.f32 %v2184_v4, %v311_v49 }
  0x94   :  { %v294_v58 = vmul.f32 %v2170_v7, %v2208_v40  ;;  %v295_v59 = vmul.f32 %v2172_v8, %v2208_v40  ;;  %v2248_v61 = vmul.f32 %v2174_v11, %v2208_v40  ;;  %v2252_v62 = vmul.f32 %v2176_v0, %v2208_v40  ;;  %v2254_v9 = vpop.permute.xlu1 %138  ;;  %v2264_v37 = vpop.permute.xlu0 %128 }
  0x95   :  { %4053 = vst [vmem:[#allocation30_spill] sm:$0xff] %v2254_v9  ;;  %1535 = vtanh.f32 %v557_v54  ;;  %v541_v46 = vadd.f32 %v2178_v12, %v292_v52  ;;  %v542_v47 = vadd.f32 %v2180_v2, %v293_v53  ;;  %v316_v48 = vmul.f32 %v2166_v5, %v2254_v9 }
  0x96   :  { %1537 = vtanh.f32 %v558_v55  ;;  %v543_v49 = vadd.f32 %v2182_v13, %v294_v58  ;;  %v544_v39 = vadd.f32 %v2184_v4, %v295_v59  ;;  %v317_v41 = vmul.f32 %v2168_v6, %v2254_v9 }
  0x97   :  { %1539 = vtanh.f32 %v559_v56  ;;  %v318_v54 = vmul.f32 %v2170_v7, %v2254_v9  ;;  %v319_v52 = vmul.f32 %v2172_v8, %v2254_v9  ;;  %v2272_v53 = vmul.f32 %v2174_v11, %v2254_v9 }
  0x98   :  { %1541 = vtanh.f32 %v560_v57  ;;  %v2276_v55 = vmul.f32 %v2176_v0, %v2254_v9  ;;  %v565_v58 = vadd.f32 %v2178_v12, %v316_v48  ;;  %v566_v59 = vadd.f32 %v2180_v2, %v317_v41  ;;  %v2290_v30 = vpop.permute.xlu1 %148  ;;  %v2310_v23 = vpop.permute.xlu0 %143 }
  0x99   :  { %4054 = vst [vmem:[#allocation31_spill] sm:$0xff] %v2272_v53  ;;  %1543 = vtanh.f32 %v541_v46  ;;  %v567_v56 = vadd.f32 %v2182_v13, %v318_v54  ;;  %v568_v38 = vadd.f32 %v2184_v4, %v319_v52  ;;  %v300_v32 = vmul.f32 %v2166_v5, %v2264_v37  ;;  %4056 = vst [vmem:[#allocation33_spill] sm:$0xff] %v2290_v30 }
  0x9a   :  { %4055 = vst [vmem:[#allocation32_spill] sm:$0xff] %v2276_v55  ;;  %1545 = vtanh.f32 %v542_v47  ;;  %v301_v57 = vmul.f32 %v2168_v6, %v2264_v37  ;;  %v302_v36 = vmul.f32 %v2170_v7, %v2264_v37  ;;  %v303_v48 = vmul.f32 %v2172_v8, %v2264_v37  ;;  %4057 = vst [vmem:[#allocation34_spill] sm:$0xff] %v2310_v23 }
  0x9b   :  { %1547 = vtanh.f32 %v543_v49  ;;  %v2294_v41 = vmul.f32 %v2174_v11, %v2264_v37  ;;  %v2298_v46 = vmul.f32 %v2176_v0, %v2264_v37  ;;  %v549_v47 = vadd.f32 %v2178_v12, %v300_v32 }
  0x9c   :  { %1549 = vtanh.f32 %v544_v39  ;;  %v550_v54 = vadd.f32 %v2180_v2, %v301_v57  ;;  %v551_v52 = vadd.f32 %v2182_v13, %v302_v36  ;;  %v552_v31 = vadd.f32 %v2184_v4, %v303_v48  ;;  %v2334_v17 = vpop.permute.xlu1 %158 }
  0x9d   :  { %1551 = vtanh.f32 %v565_v58  ;;  %v332_v49 = vmul.f32 %v2166_v5, %v2290_v30  ;;  %v333_v25 = vmul.f32 %v2168_v6, %v2290_v30  ;;  %v334_v29 = vmul.f32 %v2170_v7, %v2290_v30  ;;  %4060 = vst [vmem:[#allocation37_spill] sm:$0xff] %v2334_v17 }
  0x9e   :  { %1553 = vtanh.f32 %v566_v59  ;;  %v335_v32 = vmul.f32 %v2172_v8, %v2290_v30  ;;  %v2316_v36 = vmul.f32 %v2174_v11, %v2290_v30  ;;  %v2320_v39 = vmul.f32 %v2176_v0, %v2290_v30 }
  0x9f   :  { %v2322_v58 = vpop.eup %1535  ;;  %1555 = vtanh.f32 %v567_v56  ;;  %v581_v57 = vadd.f32 %v2178_v12, %v332_v49  ;;  %v582_v48 = vadd.f32 %v2180_v2, %v333_v25  ;;  %v583_v59 = vadd.f32 %v2182_v13, %v334_v29 }
  0xa0   :  { %4058 = vst [vmem:[#allocation35_spill] sm:$0xff] %v2316_v36  ;;  %4059 = vst [vmem:[#allocation36_spill] sm:$0xff] %v2320_v39  ;;  %v2327_v24 = vpop.eup %1537  ;;  %1557 = vtanh.f32 %v568_v38  ;;  %v584_v18 = vadd.f32 %v2184_v4, %v335_v32  ;;  %v324_v22 = vmul.f32 %v2166_v5, %v2310_v23  ;;  %v325_v16 = vmul.f32 %v2168_v6, %v2310_v23 }
  0xa1   :  { %v2336_v56 = vpop.eup %1539  ;;  %1559 = vtanh.f32 %v549_v47  ;;  %v326_v25 = vmul.f32 %v2170_v7, %v2310_v23  ;;  %v327_v29 = vmul.f32 %v2172_v8, %v2310_v23  ;;  %v2344_v38 = vmul.f32 %v2174_v11, %v2310_v23 }
  0xa2   :  { %v2346_v49 = vpop.eup %1541  ;;  %1561 = vtanh.f32 %v550_v54  ;;  %v2350_v32 = vmul.f32 %v2176_v0, %v2310_v23  ;;  %v573_v10 = vadd.f32 %v2178_v12, %v324_v22  ;;  %v574_v47 = vadd.f32 %v2180_v2, %v325_v16 }
  0xa3   :  { %4061 = vst [vmem:[#allocation38_spill] sm:$0xff] %v2344_v38  ;;  %v2354_v3 = vpop.eup %1543  ;;  %1563 = vtanh.f32 %v551_v52  ;;  %v575_v1 = vadd.f32 %v2182_v13, %v326_v25  ;;  %v576_v60 = vadd.f32 %v2184_v4, %v327_v29  ;;  %v348_v63 = vmul.f32 %v2166_v5, %v2334_v17  ;;  %v2368_v52 = vpop.permute.xlu0 %153 }
  0xa4   :  { %4062 = vst [vmem:[#allocation39_spill] sm:$0xff] %v2350_v32  ;;  %v2360_v39 = vpop.eup %1545  ;;  %1565 = vtanh.f32 %v552_v31  ;;  %v349_v54 = vmul.f32 %v2168_v6, %v2334_v17  ;;  %v350_v22 = vmul.f32 %v2170_v7, %v2334_v17  ;;  %v351_v16 = vmul.f32 %v2172_v8, %v2334_v17  ;;  %4063 = vst [vmem:[#allocation40_spill] sm:$0xff] %v2368_v52 }
  0xa5   :  { %v2370_v25 = vpop.eup %1547  ;;  %1567 = vtanh.f32 %v581_v57  ;;  %v2374_v29 = vmul.f32 %v2174_v11, %v2334_v17  ;;  %v2378_v31 = vmul.f32 %v2176_v0, %v2334_v17  ;;  %v597_v36 = vadd.f32 %v2178_v12, %v348_v63  ;;  %v2394_v17 = vpop.permute.xlu1 %168 }
  0xa6   :  { %v2381_v30 = vpop.eup %1549  ;;  %1569 = vtanh.f32 %v582_v48  ;;  %v598_v32 = vadd.f32 %v2180_v2, %v349_v54  ;;  %v599_v38 = vadd.f32 %v2182_v13, %v350_v22  ;;  %v600_v23 = vadd.f32 %v2184_v4, %v351_v16  ;;  %4067 = vst [vmem:[#allocation44_spill] sm:$0xff] %v2394_v17 }
  0xa7   :  { %4064 = vst [vmem:[#allocation41_spill] sm:$0xff] %v2374_v29  ;;  %4065 = vst [vmem:[#allocation42_spill] sm:$0xff] %v2378_v31  ;;  %v2386_v57 = vpop.eup %1551  ;;  %1571 = vtanh.f32 %v583_v59  ;;  %v340_v29 = vmul.f32 %v2166_v5, %v2368_v52  ;;  %v341_v31 = vmul.f32 %v2168_v6, %v2368_v52  ;;  %v342_v63 = vmul.f32 %v2170_v7, %v2368_v52 }
  0xa8   :  { %4066 = vst [vmem:[#allocation43_spill] sm:$0xff] %v2386_v57  ;;  %v2396_v48 = vpop.eup %1553  ;;  %1573 = vtanh.f32 %v584_v18  ;;  %v343_v54 = vmul.f32 %v2172_v8, %v2368_v52  ;;  %v2402_v59 = vmul.f32 %v2174_v11, %v2368_v52  ;;  %v2406_v22 = vmul.f32 %v2176_v0, %v2368_v52  ;;  %v2420_v52 = vpop.permute.xlu0 %163 }
  0xa9   :  { %4068 = vst [vmem:[#allocation45_spill] sm:$0xff] %v2396_v48  ;;  %v2408_v16 = vpop.eup %1555  ;;  %1575 = vtanh.f32 %v573_v10  ;;  %v589_v45 = vadd.f32 %v2178_v12, %v340_v29  ;;  %v590_v44 = vadd.f32 %v2180_v2, %v341_v31  ;;  %v591_v18 = vadd.f32 %v2182_v13, %v342_v63  ;;  %4073 = vst [vmem:[#allocation50_spill] sm:$0xff] %v2420_v52 }
  0xaa   :  { %4069 = vst [vmem:[#allocation46_spill] sm:$0xff] %v2402_v59  ;;  %4070 = vst [vmem:[#allocation47_spill] sm:$0xff] %v2406_v22  ;;  %v2413_v48 = vpop.eup %1557  ;;  %1577 = vtanh.f32 %v574_v47  ;;  %v592_v43 = vadd.f32 %v2184_v4, %v343_v54  ;;  %v364_v59 = vmul.f32 %v2166_v5, %v2394_v17  ;;  %v365_v22 = vmul.f32 %v2168_v6, %v2394_v17 }
  0xab   :  { %4071 = vst [vmem:[#allocation48_spill] sm:$0xff] %v2408_v16  ;;  %4072 = vst [vmem:[#allocation49_spill] sm:$0xff] %v2413_v48  ;;  %v2422_v10 = vpop.eup %1559  ;;  %1579 = vtanh.f32 %v575_v1  ;;  %v366_v29 = vmul.f32 %v2170_v7, %v2394_v17  ;;  %v367_v31 = vmul.f32 %v2172_v8, %v2394_v17  ;;  %v2430_v47 = vmul.f32 %v2174_v11, %v2394_v17 }
  0xac   :  { %v2432_v63 = vpop.eup %1561  ;;  %1581 = vtanh.f32 %v576_v60  ;;  %v2436_v54 = vmul.f32 %v2176_v0, %v2394_v17  ;;  %v613_v48 = vadd.f32 %v2178_v12, %v364_v59  ;;  %v614_v1 = vadd.f32 %v2180_v2, %v365_v22 }
  0xad   :  { %4074 = vst [vmem:[#allocation51_spill] sm:$0xff] %v2430_v47  ;;  %4075 = vst [vmem:[#allocation52_spill] sm:$0xff] %v2432_v63  ;;  %v2440_v16 = vpop.eup %1563  ;;  %1583 = vtanh.f32 %v597_v36  ;;  %v615_v57 = vadd.f32 %v2182_v13, %v366_v29  ;;  %v616_v42 = vadd.f32 %v2184_v4, %v367_v31  ;;  %v356_v47 = vmul.f32 %v2166_v5, %v2420_v52  ;;  %v2454_v36 = vpop.permute.xlu1 %178 }
  0xae   :  { %4076 = vst [vmem:[#allocation53_spill] sm:$0xff] %v2436_v54  ;;  %4077 = vst [vmem:[#allocation54_spill] sm:$0xff] %v2440_v16  ;;  %v2446_v55 = vpop.eup %1565  ;;  %1585 = vtanh.f32 %v598_v32  ;;  %v357_v60 = vmul.f32 %v2168_v6, %v2420_v52  ;;  %v358_v59 = vmul.f32 %v2170_v7, %v2420_v52  ;;  %v359_v22 = vmul.f32 %v2172_v8, %v2420_v52 }
  0xaf   :  { %4078 = vst [vmem:[#allocation55_spill] sm:$0xff] %v2446_v55  ;;  %4079 = vst [vmem:[#allocation56_spill] sm:$0xff] %v2454_v36  ;;  %v2456_v29 = vpop.eup %1567  ;;  %1587 = vtanh.f32 %v599_v38  ;;  %v2460_v31 = vmul.f32 %v2174_v11, %v2420_v52  ;;  %v2464_v32 = vmul.f32 %v2176_v0, %v2420_v52  ;;  %v605_v54 = vadd.f32 %v2178_v12, %v356_v47  ;;  %v2480_v52 = vpop.permute.xlu0 %173 }
  0xb0   :  { %4080 = vst [vmem:[#allocation57_spill] sm:$0xff] %v2456_v29  ;;  %v2467_v17 = vpop.eup %1569  ;;  %1589 = vtanh.f32 %v600_v23  ;;  %v606_v53 = vadd.f32 %v2180_v2, %v357_v60  ;;  %v607_v9 = vadd.f32 %v2182_v13, %v358_v59  ;;  %v608_v29 = vadd.f32 %v2184_v4, %v359_v22  ;;  %4085 = vst [vmem:[#allocation62_spill] sm:$0xff] %v2480_v52 }
  0xb1   :  { %4081 = vst [vmem:[#allocation58_spill] sm:$0xff] %v2460_v31  ;;  %4082 = vst [vmem:[#allocation59_spill] sm:$0xff] %v2464_v32  ;;  %v2472_v38 = vpop.eup %1571  ;;  %1591 = vtanh.f32 %v589_v45  ;;  %v380_v31 = vmul.f32 %v2166_v5, %v2454_v36  ;;  %v381_v32 = vmul.f32 %v2168_v6, %v2454_v36  ;;  %v382_v47 = vmul.f32 %v2170_v7, %v2454_v36 }
  0xb2   :  { %4083 = vst [vmem:[#allocation60_spill] sm:$0xff] %v2467_v17  ;;  %4084 = vst [vmem:[#allocation61_spill] sm:$0xff] %v2472_v38  ;;  %v2482_v23 = vpop.eup %1573  ;;  %1593 = vtanh.f32 %v590_v44  ;;  %v383_v60 = vmul.f32 %v2172_v8, %v2454_v36  ;;  %v2488_v45 = vmul.f32 %v2174_v11, %v2454_v36  ;;  %v2492_v59 = vmul.f32 %v2176_v0, %v2454_v36  ;;  %v2506_v36 = vpop.permute.xlu1 %188 }
  0xb3   :  { %4086 = vst [vmem:[#allocation63_spill] sm:$0xff] %v2482_v23  ;;  %v2494_v22 = vpop.eup %1575  ;;  %1595 = vtanh.f32 %v591_v18  ;;  %v629_v38 = vadd.f32 %v2178_v12, %v380_v31  ;;  %v630_v17 = vadd.f32 %v2180_v2, %v381_v32  ;;  %v631_v44 = vadd.f32 %v2182_v13, %v382_v47  ;;  %4091 = vst [vmem:[#allocation68_spill] sm:$0xff] %v2506_v36 }
  0xb4   :  { %4087 = vst [vmem:[#allocation64_spill] sm:$0xff] %v2488_v45  ;;  %4088 = vst [vmem:[#allocation65_spill] sm:$0xff] %v2492_v59  ;;  %v2499_v23 = vpop.eup %1577  ;;  %1597 = vtanh.f32 %v592_v43  ;;  %v632_v55 = vadd.f32 %v2184_v4, %v383_v60  ;;  %v372_v45 = vmul.f32 %v2166_v5, %v2480_v52  ;;  %v373_v59 = vmul.f32 %v2168_v6, %v2480_v52 }
  0xb5   :  { %4089 = vst [vmem:[#allocation66_spill] sm:$0xff] %v2494_v22  ;;  %4090 = vst [vmem:[#allocation67_spill] sm:$0xff] %v2499_v23  ;;  %v2508_v18 = vpop.eup %1579  ;;  %1599 = vtanh.f32 %v613_v48  ;;  %v374_v31 = vmul.f32 %v2170_v7, %v2480_v52  ;;  %v375_v32 = vmul.f32 %v2172_v8, %v2480_v52  ;;  %v2516_v43 = vmul.f32 %v2174_v11, %v2480_v52 }
  0xb6   :  { %4092 = vst [vmem:[#allocation69_spill] sm:$0xff] %v2508_v18  ;;  %v2518_v47 = vpop.eup %1581  ;;  %1601 = vtanh.f32 %v614_v1  ;;  %v2522_v60 = vmul.f32 %v2176_v0, %v2480_v52  ;;  %v621_v18 = vadd.f32 %v2178_v12, %v372_v45  ;;  %v622_v48 = vadd.f32 %v2180_v2, %v373_v59  ;;  %v2542_v59 = vpop.permute.xlu0 %183 }
  0xb7   :  { %4093 = vst [vmem:[#allocation70_spill] sm:$0xff] %v2516_v43  ;;  %4094 = vst [vmem:[#allocation71_spill] sm:$0xff] %v2518_v47  ;;  %v2526_v23 = vpop.eup %1583  ;;  %1603 = vtanh.f32 %v615_v57  ;;  %v623_v22 = vadd.f32 %v2182_v13, %v374_v31  ;;  %v2530_v16 = vadd.f32 %v2184_v4, %v375_v32  ;;  %v396_v43 = vmul.f32 %v2166_v5, %v2506_v36 }
  0xb8   :  { %4095 = vst [vmem:[#allocation72_spill] sm:$0xff] %v2522_v60  ;;  %4096 = vst [vmem:[#allocation73_spill] sm:$0xff] %v2526_v23  ;;  %v2534_v1 = vpop.eup %1585  ;;  %1605 = vtanh.f32 %v616_v42  ;;  %v397_v60 = vmul.f32 %v2168_v6, %v2506_v36  ;;  %v398_v45 = vmul.f32 %v2170_v7, %v2506_v36  ;;  %v399_v57 = vmul.f32 %v2172_v8, %v2506_v36 }
  0xb9   :  { %4097 = vst [vmem:[#allocation74_spill] sm:$0xff] %v2534_v1  ;;  %4098 = vst [vmem:[#allocation75_spill] sm:$0xff] %v2542_v59  ;;  %v2544_v31 = vpop.eup %1587  ;;  %1607 = vtanh.f32 %v605_v54  ;;  %v2548_v32 = vmul.f32 %v2174_v11, %v2506_v36  ;;  %v2552_v42 = vmul.f32 %v2176_v0, %v2506_v36  ;;  %v645_v52 = vadd.f32 %v2178_v12, %v396_v43 }
  0xba   :  { %4099 = vst [vmem:[#allocation76_spill] sm:$0xff] %v2544_v31  ;;  %v2555_v1 = vpop.eup %1589  ;;  %1609 = vtanh.f32 %v606_v53  ;;  %v646_v23 = vadd.f32 %v2180_v2, %v397_v60  ;;  %v2559_v47 = vadd.f32 %v2182_v13, %v398_v45  ;;  %v2562_v54 = vadd.f32 %v2184_v4, %v399_v57 }
  0xbb   :  { %4100 = vst [vmem:[#allocation77_spill] sm:$0xff] %v2548_v32  ;;  %4101 = vst [vmem:[#allocation78_spill] sm:$0xff] %v2552_v42  ;;  %v2564_v31 = vpop.eup %1591  ;;  %1611 = vtanh.f32 %v607_v9  ;;  %v388_v32 = vmul.f32 %v2166_v5, %v2542_v59  ;;  %v389_v43 = vmul.f32 %v2168_v6, %v2542_v59  ;;  %v390_v53 = vmul.f32 %v2170_v7, %v2542_v59  ;;  %v2572_v42 = vpop.permute.xlu1 %198 }
  0xbc   :  { %4102 = vst [vmem:[#allocation79_spill] sm:$0xff] %v2555_v1  ;;  %4103 = vst [vmem:[#allocation80_spill] sm:$0xff] %v2564_v31  ;;  %v2574_v60 = vpop.eup %1593  ;;  %1613 = vtanh.f32 %v608_v29  ;;  %v391_v45 = vmul.f32 %v2172_v8, %v2542_v59  ;;  %v2580_v9 = vmul.f32 %v2174_v11, %v2542_v59  ;;  %v2584_v57 = vmul.f32 %v2176_v0, %v2542_v59  ;;  %v2604_v59 = vpop.permute.xlu0 %193 }
  0xbd   :  { %4104 = vst [vmem:[#allocation81_spill] sm:$0xff] %v2572_v42  ;;  %4105 = vst [vmem:[#allocation82_spill] sm:$0xff] %v2574_v60  ;;  %v2586_v36 = vpop.eup %1595  ;;  %1615 = vtanh.f32 %v629_v38  ;;  %v637_v1 = vadd.f32 %v2178_v12, %v388_v32  ;;  %v2590_v31 = vadd.f32 %v2180_v2, %v389_v43  ;;  %v2593_v29 = vadd.f32 %v2182_v13, %v390_v53 }
  0xbe   :  { %4106 = vst [vmem:[#allocation83_spill] sm:$0xff] %v2580_v9  ;;  %4107 = vst [vmem:[#allocation84_spill] sm:$0xff] %v2584_v57  ;;  %v2595_v60 = vpop.eup %1597  ;;  %1617 = vtanh.f32 %v630_v17  ;;  %v2598_v9 = vadd.f32 %v2184_v4, %v391_v45  ;;  %v412_v57 = vmul.f32 %v2166_v5, %v2572_v42  ;;  %v413_v38 = vmul.f32 %v2168_v6, %v2572_v42 }
  0xbf   :  { %4108 = vst [vmem:[#allocation85_spill] sm:$0xff] %v2586_v36  ;;  %4109 = vst [vmem:[#allocation86_spill] sm:$0xff] %v2595_v60  ;;  %v2606_v32 = vpop.eup %1599  ;;  %1619 = vtanh.f32 %v631_v44  ;;  %v414_v43 = vmul.f32 %v2170_v7, %v2572_v42  ;;  %v415_v17 = vmul.f32 %v2172_v8, %v2572_v42  ;;  %v2614_v53 = vmul.f32 %v2174_v11, %v2572_v42 }
  0xc0   :  { %4110 = vst [vmem:[#allocation87_spill] sm:$0xff] %v2604_v59  ;;  %4111 = vst [vmem:[#allocation88_spill] sm:$0xff] %v2606_v32  ;;  %v2616_v45 = vpop.eup %1601  ;;  %1621 = vtanh.f32 %v632_v55  ;;  %v2620_v60 = vmul.f32 %v2176_v0, %v2572_v42  ;;  %v2623_v32 = vadd.f32 %v2178_v12, %v412_v57  ;;  %v2626_v44 = vadd.f32 %v2180_v2, %v413_v38 }
  0xc1   :  { %4112 = vst [vmem:[#allocation89_spill] sm:$0xff] %v2614_v53  ;;  %4113 = vst [vmem:[#allocation90_spill] sm:$0xff] %v2616_v45  ;;  %v2628_v36 = vpop.eup %1603  ;;  %1623 = vtanh.f32 %v621_v18  ;;  %v2631_v63 = vadd.f32 %v2182_v13, %v414_v43  ;;  %v2634_v53 = vadd.f32 %v2184_v4, %v415_v17  ;;  %v404_v55 = vmul.f32 %v2166_v5, %v2604_v59  ;;  %v2646_v43 = vpop.permute.xlu1 %208 }
  0xc2   :  { %4114 = vst [vmem:[#allocation91_spill] sm:$0xff] %v2620_v60  ;;  %4115 = vst [vmem:[#allocation92_spill] sm:$0xff] %v2628_v36  ;;  %v2638_v42 = vpop.eup %1605  ;;  %1625 = vtanh.f32 %v622_v48  ;;  %v405_v57 = vmul.f32 %v2168_v6, %v2604_v59  ;;  %v406_v38 = vmul.f32 %v2170_v7, %v2604_v59  ;;  %v407_v18 = vmul.f32 %v2172_v8, %v2604_v59 }
  0xc3   :  { %4116 = vst [vmem:[#allocation93_spill] sm:$0xff] %v2638_v42  ;;  %4117 = vst [vmem:[#allocation94_spill] sm:$0xff] %v2646_v43  ;;  %v2648_v60 = vpop.eup %1607  ;;  %1627 = vtanh.f32 %v623_v22  ;;  %v2652_v17 = vmul.f32 %v2174_v11, %v2604_v59  ;;  %v2656_v48 = vmul.f32 %v2176_v0, %v2604_v59  ;;  %v2659_v42 = vadd.f32 %v2178_v12, %v404_v55 }
  0xc4   :  { %4118 = vst [vmem:[#allocation95_spill] sm:$0xff] %v2648_v60  ;;  %v2661_v36 = vpop.eup %1609  ;;  %1629 = vtanh.f32 %v2530_v16  ;;  %v2665_v45 = vadd.f32 %v2180_v2, %v405_v57  ;;  %v2668_v22 = vadd.f32 %v2182_v13, %v406_v38  ;;  %v2671_v60 = vadd.f32 %v2184_v4, %v407_v18 }
  0xc5   :  { %4119 = vst [vmem:[#allocation96_spill] sm:$0xff] %v2652_v17  ;;  %4120 = vst [vmem:[#allocation97_spill] sm:$0xff] %v2656_v48  ;;  %v2673_v17 = vpop.eup %1611  ;;  %1631 = vtanh.f32 %v645_v52  ;;  %v428_v55 = vmul.f32 %v2166_v5, %v2646_v43  ;;  %v429_v48 = vmul.f32 %v2168_v6, %v2646_v43  ;;  %v430_v16 = vmul.f32 %v2170_v7, %v2646_v43 }
  0xc6   :  { %4121 = vst [vmem:[#allocation98_spill] sm:$0xff] %v2661_v36  ;;  %4122 = vst [vmem:[#allocation99_spill] sm:$0xff] %v2673_v17  ;;  %v2681_v57 = vpop.eup %1613  ;;  %1633 = vtanh.f32 %v646_v23  ;;  %v431_v38 = vmul.f32 %v2172_v8, %v2646_v43  ;;  %v2687_v18 = vmul.f32 %v2174_v11, %v2646_v43  ;;  %v2691_v52 = vmul.f32 %v2176_v0, %v2646_v43 }
  0xc7   :  { %4123 = vst [vmem:[#allocation100_spill] sm:$0xff] %v2681_v57  ;;  %v2693_v59 = vpop.eup %1615  ;;  %1635 = vtanh.f32 %v2559_v47  ;;  %v2697_v17 = vadd.f32 %v2178_v12, %v428_v55  ;;  %v2700_v23 = vadd.f32 %v2180_v2, %v429_v48  ;;  %v2703_v57 = vadd.f32 %v2182_v13, %v430_v16  ;;  %v2715_v55 = vpop.permute.xlu0 %203 }
  0xc8   :  { %4124 = vst [vmem:[#allocation101_spill] sm:$0xff] %v2687_v18  ;;  %4125 = vst [vmem:[#allocation102_spill] sm:$0xff] %v2691_v52  ;;  %v2705_v36 = vpop.eup %1617  ;;  %1637 = vtanh.f32 %v2562_v54  ;;  %v2709_v18 = vadd.f32 %v2184_v4, %v431_v38  ;;  %v298_v52 = vmul.f32 %v2186_v14, %v2208_v40  ;;  %v299_v47 = vmul.f32 %v2188_v15, %v2208_v40 }
  0xc9   :  { %4126 = vst [vmem:[#allocation103_spill] sm:$0xff] %v2693_v59  ;;  %4127 = vst [vmem:[#allocation104_spill] sm:$0xff] %v2705_v36  ;;  %v2717_v48 = vpop.eup %1619  ;;  %1639 = vtanh.f32 %v637_v1  ;;  %v2721_v16 = vadd.f32 %v2190_v19, %v2248_v61  ;;  %v2725_v54 = vadd.f32 %v2192_v20, %v2252_v62  ;;  %v998_v38 = vmul.f32 %v2354_v3, %v2198_v27 }
  0xca   :  { %4128 = vst [vmem:[#allocation105_spill] sm:$0xff] %v2715_v55  ;;  %4129 = vst [vmem:[#allocation106_spill] sm:$0xff] %v2717_v48  ;;  %v2729_v43 = vpop.eup %1621  ;;  %1641 = vtanh.f32 %v2590_v31  ;;  %v2733_v40 = vadd.f32 %v2194_v21, %v298_v52  ;;  %v2736_v1 = vadd.f32 %v2196_v26, %v299_v47  ;;  %v999_v61 = vmul.f32 %v2360_v39, %v2200_v28 }
  0xcb   :  { %4130 = vst [vmem:[#allocation107_spill] sm:$0xff] %v2729_v43  ;;  %v2740_v48 = vpop.eup %1623  ;;  %1643 = vtanh.f32 %v2593_v29  ;;  %v1000_v3 = vmul.f32 %v2370_v25, %v2202_v33  ;;  %v1001_v62 = vmul.f32 %v2381_v30, %v2204_v34  ;;  %v420_v31 = vmul.f32 %v2166_v5, %v2715_v55  ;;  %v2756_v43 = vpop.permute.xlu1 %218 }
  0xcc   :  { %v2749_v52 = vpop.eup %1625  ;;  %1645 = vtanh.f32 %v2598_v9  ;;  %v1206_v47 = vadd.f32 %v999_v61, %v998_v38  ;;  %v421_v39 = vmul.f32 %v2168_v6, %v2715_v55  ;;  %v422_v29 = vmul.f32 %v2170_v7, %v2715_v55  ;;  %4131 = vst [vmem:[#allocation108_spill] sm:$0xff] %v2756_v43 }
  0xcd   :  { %v2758_v25 = vpop.eup %1627  ;;  %1647 = vtanh.f32 %v2623_v32  ;;  %v423_v30 = vmul.f32 %v2172_v8, %v2715_v55  ;;  %v2765_v36 = vmul.f32 %v2174_v11, %v2715_v55  ;;  %v2769_v9 = vmul.f32 %v2176_v0, %v2715_v55 }
  0xce   :  { %4132 = vst [vmem:[#allocation109_spill] sm:$0xff] %v2758_v25  ;;  %v2771_v38 = vpop.eup %1629  ;;  %1649 = vtanh.f32 %v2626_v44  ;;  %v1207_v61 = vadd.f32 %v1206_v47, %v1000_v3  ;;  %v2775_v59 = vadd.f32 %v2178_v12, %v420_v31  ;;  %v2778_v32 = vadd.f32 %v2180_v2, %v421_v39 }
  0xcf   :  { %4133 = vst [vmem:[#allocation110_spill] sm:$0xff] %v2765_v36  ;;  %4134 = vst [vmem:[#allocation111_spill] sm:$0xff] %v2769_v9  ;;  %v2780_v25 = vpop.eup %1631  ;;  %1651 = vtanh.f32 %v2631_v63  ;;  %v2784_v36 = vadd.f32 %v2182_v13, %v422_v29  ;;  %v2787_v9 = vadd.f32 %v2184_v4, %v423_v30  ;;  %v444_v44 = vmul.f32 %v2166_v5, %v2756_v43 }
  0xd0   :  { %4135 = vst [vmem:[#allocation112_spill] sm:$0xff] %v2771_v38  ;;  %4136 = vst [vmem:[#allocation113_spill] sm:$0xff] %v2780_v25  ;;  %v2791_v3 = vpop.eup %1633  ;;  %1653 = vtanh.f32 %v2634_v53  ;;  %v2794_v31 = vadd.f32 %v1207_v61, %v1001_v62  ;;  %v445_v47 = vmul.f32 %v2168_v6, %v2756_v43  ;;  %v446_v63 = vmul.f32 %v2170_v7, %v2756_v43 }
  0xd1   :  { %4137 = vst [vmem:[#allocation114_spill] sm:$0xff] %v2791_v3  ;;  %v2800_v39 = vpop.eup %1635  ;;  %1655 = vtanh.f32 %v2659_v42  ;;  %v447_v29 = vmul.f32 %v2172_v8, %v2756_v43  ;;  %v2807_v30 = vmul.f32 %v2174_v11, %v2756_v43  ;;  %v2811_v53 = vmul.f32 %v2176_v0, %v2756_v43 }
  0xd2   :  { %4138 = vst [vmem:[#allocation115_spill] sm:$0xff] %v2800_v39  ;;  %v2813_v62 = vpop.eup %1637  ;;  %1657 = vtanh.f32 %v2665_v45  ;;  %v2817_v61 = vadd.f32 %v2178_v12, %v444_v44  ;;  %v2820_v42 = vadd.f32 %v2180_v2, %v445_v47  ;;  %v2823_v55 = vadd.f32 %v2182_v13, %v446_v63 }
  0xd3   :  { %4139 = vst [vmem:[#allocation116_spill] sm:$0xff] %v2807_v30  ;;  %4140 = vst [vmem:[#allocation117_spill] sm:$0xff] %v2811_v53  ;;  %v2825_v39 = vpop.eup %1639  ;;  %1659 = vtanh.f32 %v2668_v22  ;;  %v2829_v30 = vadd.f32 %v2184_v4, %v447_v29  ;;  %v314_v53 = vmul.f32 %v2186_v14, %v2206_v35  ;;  %v315_v45 = vmul.f32 %v2188_v15, %v2206_v35 }
  0xd4   :  { %4141 = vst [vmem:[#allocation118_spill] sm:$0xff] %v2813_v62  ;;  %4142 = vst [vmem:[#allocation119_spill] sm:$0xff] %v2825_v39  ;;  %v2835_v44 = vpop.eup %1641  ;;  %1661 = vtanh.f32 %v2671_v60  ;;  %v2840_v47 = vadd.f32 %v2190_v19, %v2228_v50  ;;  %v2844_v22 = vadd.f32 %v2192_v20, %v2232_v51  ;;  %v1014_v63 = vmul.f32 %v2322_v58, %v2198_v27  ;;  %v2877_v62 = vpop.permute.xlu0 %213 }
  0xd5   :  { %4143 = vst [vmem:[#allocation120_spill] sm:$0xff] %v2835_v44  ;;  %v2848_v29 = vpop.eup %1643  ;;  %1663 = vtanh.f32 %v2697_v17  ;;  %v2852_v35 = vadd.f32 %v2194_v21, %v314_v53  ;;  %v2855_v60 = vadd.f32 %v2196_v26, %v315_v45  ;;  %v1015_v50 = vmul.f32 %v2327_v24, %v2200_v28  ;;  %4147 = vst [vmem:[#allocation124_spill] sm:$0xff] %v2877_v62 }
  0xd6   :  { %4144 = vst [vmem:[#allocation121_spill] sm:$0xff] %v2848_v29  ;;  %v2859_v43 = vpop.eup %1645  ;;  %1665 = vtanh.f32 %v2700_v23  ;;  %v1016_v51 = vmul.f32 %v2336_v56, %v2202_v33  ;;  %v1017_v58 = vmul.f32 %v2346_v49, %v2204_v34  ;;  %v306_v17 = vmul.f32 %v2186_v14, %v2264_v37 }
  0xd7   :  { %4145 = vst [vmem:[#allocation122_spill] sm:$0xff] %v2859_v43  ;;  %v2868_v53 = vpop.eup %1647  ;;  %1667 = vtanh.f32 %v2703_v57  ;;  %v1224_v45 = vadd.f32 %v1015_v50, %v1014_v63  ;;  %v307_v24 = vmul.f32 %v2188_v15, %v2264_v37  ;;  %v2875_v23 = vadd.f32 %v2190_v19, %v2294_v41  ;;  %v4174_v43 = vld [vmem:[#allocation28_spill] sm:$0xff] }
  0xd8   :  { %4146 = vst [vmem:[#allocation123_spill] sm:$0xff] %v2868_v53  ;;  %v2879_v56 = vpop.eup %1649  ;;  %1669 = vtanh.f32 %v2709_v18  ;;  %v2884_v49 = vadd.f32 %v2192_v20, %v2298_v46  ;;  %v2887_v57 = vadd.f32 %v2194_v21, %v306_v17  ;;  %v1006_v37 = vmul.f32 %v2422_v10, %v2198_v27  ;;  %v4150_v18 = vld [vmem:[#allocation52_spill] sm:$0xff]  ;;  %v4152_v46 = vld [vmem:[#allocation54_spill] sm:$0xff]  ;;  %v4153_v10 = vld [vmem:[#allocation55_spill] sm:$0xff] }
  0xd9   :  { %4148 = vst [vmem:[#allocation125_spill] sm:$0xff] %v2879_v56  ;;  %v2891_v63 = vpop.eup %1651  ;;  %1671 = vtanh.f32 %v2721_v16  ;;  %v1225_v41 = vadd.f32 %v1224_v45, %v1016_v51  ;;  %v2895_v50 = vadd.f32 %v2196_v26, %v307_v24  ;;  %v1007_v56 = vmul.f32 %v4150_v18, %v2200_v28 }
  0xda   :  { %4149 = vst [vmem:[#allocation126_spill] sm:$0xff] %v2891_v63  ;;  %v2899_v53 = vpop.eup %1653  ;;  %1673 = vtanh.f32 %v2725_v54  ;;  %v1008_v17 = vmul.f32 %v4152_v46, %v2202_v33  ;;  %v1009_v3 = vmul.f32 %v4153_v10, %v2204_v34  ;;  %v436_v16 = vmul.f32 %v2166_v5, %v2877_v62 }
  0xdb   :  { %4151 = vst [vmem:[#allocation52_spill] sm:$0xff] %v2899_v53  ;;  %v2908_v51 = vpop.eup %1655  ;;  %1675 = vtanh.f32 %v2733_v40  ;;  %v2911_v45 = vadd.f32 %v1225_v41, %v1017_v58  ;;  %v1215_v24 = vadd.f32 %v1007_v56, %v1006_v37  ;;  %v437_v18 = vmul.f32 %v2168_v6, %v2877_v62  ;;  %v2926_v40 = vpop.permute.xlu1 %228 }
  0xdc   :  { %4154 = vst [vmem:[#allocation54_spill] sm:$0xff] %v2908_v51  ;;  %v2915_v54 = vpop.eup %1657  ;;  %1677 = vtanh.f32 %v2736_v1  ;;  %v438_v46 = vmul.f32 %v2170_v7, %v2877_v62  ;;  %v439_v10 = vmul.f32 %v2172_v8, %v2877_v62  ;;  %v2924_v53 = vmul.f32 %v2174_v11, %v2877_v62  ;;  %4157 = vst [vmem:[#allocation128_spill] sm:$0xff] %v2926_v40 }
  0xdd   :  { %4155 = vst [vmem:[#allocation55_spill] sm:$0xff] %v2915_v54  ;;  %v2928_v58 = vpop.eup %1659  ;;  %1679 = vtanh.f32 %v2775_v59  ;;  %v1216_v56 = vadd.f32 %v1215_v24, %v1008_v17  ;;  %v2933_v1 = vmul.f32 %v2176_v0, %v2877_v62  ;;  %v2936_v37 = vadd.f32 %v2178_v12, %v436_v16  ;;  %v4172_v54 = vld [vmem:[#allocation27_spill] sm:$0xff] }
  0xde   :  { %4156 = vst [vmem:[#allocation127_spill] sm:$0xff] %v2924_v53  ;;  %4158 = vst [vmem:[#allocation129_spill] sm:$0xff] %v2928_v58  ;;  %v2938_v41 = vpop.eup %1661  ;;  %1681 = vtanh.f32 %v2778_v32  ;;  %v2942_v53 = vadd.f32 %v2180_v2, %v437_v18  ;;  %v2945_v63 = vadd.f32 %v2182_v13, %v438_v46  ;;  %v2948_v59 = vadd.f32 %v2184_v4, %v439_v10 }
  0xdf   :  { %4159 = vst [vmem:[#allocation130_spill] sm:$0xff] %v2933_v1  ;;  %4160 = vst [vmem:[#allocation131_spill] sm:$0xff] %v2938_v41  ;;  %v2950_v17 = vpop.eup %1663  ;;  %1683 = vtanh.f32 %v2784_v36  ;;  %v2953_v24 = vadd.f32 %v1216_v56, %v1009_v3  ;;  %v460_v16 = vmul.f32 %v2166_v5, %v2926_v40  ;;  %v461_v32 = vmul.f32 %v2168_v6, %v2926_v40 }
  0xe0   :  { %4161 = vst [vmem:[#allocation132_spill] sm:$0xff] %v2950_v17  ;;  %v2959_v18 = vpop.eup %1665  ;;  %1685 = vtanh.f32 %v2787_v9  ;;  %v462_v46 = vmul.f32 %v2170_v7, %v2926_v40  ;;  %v463_v10 = vmul.f32 %v2172_v8, %v2926_v40  ;;  %v2968_v36 = vmul.f32 %v2174_v11, %v2926_v40 }
  0xe1   :  { %4162 = vst [vmem:[#allocation133_spill] sm:$0xff] %v2959_v18  ;;  %v2970_v3 = vpop.eup %1667  ;;  %1687 = vtanh.f32 %v2817_v61  ;;  %v2975_v56 = vmul.f32 %v2176_v0, %v2926_v40  ;;  %v2978_v9 = vadd.f32 %v2178_v12, %v460_v16  ;;  %v2981_v1 = vadd.f32 %v2180_v2, %v461_v32  ;;  %v4167_v61 = vld [vmem:[#allocation30_spill] sm:$0xff]  ;;  %v4168_v32 = vld [vmem:[#allocation31_spill] sm:$0xff] }
  0xe2   :  { %4163 = vst [vmem:[#allocation134_spill] sm:$0xff] %v2968_v36  ;;  %4164 = vst [vmem:[#allocation135_spill] sm:$0xff] %v2970_v3  ;;  %v2983_v62 = vpop.eup %1669  ;;  %1689 = vtanh.f32 %v2820_v42  ;;  %v2987_v36 = vadd.f32 %v2182_v13, %v462_v46  ;;  %v2990_v3 = vadd.f32 %v2184_v4, %v463_v10  ;;  %v322_v40 = vmul.f32 %v2186_v14, %v4167_v61  ;;  %v4169_v42 = vld [vmem:[#allocation32_spill] sm:$0xff]  ;;  %v4170_v10 = vld [vmem:[#allocation26_spill] sm:$0xff] }
  0xe3   :  { %4165 = vst [vmem:[#allocation136_spill] sm:$0xff] %v2975_v56  ;;  %4166 = vst [vmem:[#allocation137_spill] sm:$0xff] %v2983_v62  ;;  %v1672_v56 = vpop.eup %1671  ;;  %1691 = vtanh.f32 %v2823_v55  ;;  %v323_v16 = vmul.f32 %v2188_v15, %v4167_v61  ;;  %v2999_v62 = vadd.f32 %v2190_v19, %v4168_v32  ;;  %v3003_v46 = vadd.f32 %v2192_v20, %v4169_v42  ;;  %v4171_v55 = vld [vmem:[#allocation43_spill] sm:$0xff]  ;;  %v4173_v42 = vld [vmem:[#allocation45_spill] sm:$0xff] }
  0xe4   :  { %v1674_v18 = vpop.eup %1673  ;;  %v1002_v17 = vmul.f32 %v1672_v56, %v4170_v10  ;;  %1693 = vtanh.f32 %v2829_v30  ;;  %v3008_v41 = vadd.f32 %v2194_v21, %v322_v40  ;;  %v1022_v58 = vmul.f32 %v4171_v55, %v2198_v27  ;;  %v4175_v55 = vld [vmem:[#allocation48_spill] sm:$0xff] }
  0xe5   :  { %v1676_v61 = vpop.eup %1675  ;;  %v1003_v51 = vmul.f32 %v1674_v18, %v4172_v54  ;;  %1695 = vtanh.f32 %v2840_v47  ;;  %v3015_v32 = vadd.f32 %v2196_v26, %v323_v16  ;;  %v1023_v25 = vmul.f32 %v4173_v42, %v2200_v28  ;;  %v4176_v18 = vld [vmem:[#allocation29_spill] sm:$0xff] }
  0xe6   :  { %v1678_v56 = vpop.eup %1677  ;;  %v1004_v30 = vmul.f32 %v1676_v61, %v4174_v43  ;;  %v1209_v40 = vadd.f32 %v2794_v31, %v1002_v17  ;;  %1697 = vtanh.f32 %v2844_v22  ;;  %v1024_v29 = vmul.f32 %v4175_v55, %v2202_v33  ;;  %v4177_v16 = vld [vmem:[#allocation49_spill] sm:$0xff]  ;;  %v4178_v31 = vld [vmem:[#allocation34_spill] sm:$0xff] }
  0xe7   :  { %v3024_v44 = vpop.eup %1679  ;;  %v1005_v47 = vmul.f32 %v1678_v56, %v4176_v18  ;;  %1699 = vtanh.f32 %v2852_v35  ;;  %v1025_v39 = vmul.f32 %v4177_v16, %v2204_v34  ;;  %v1233_v42 = vadd.f32 %v1023_v25, %v1022_v58  ;;  %v4180_v56 = vld [vmem:[#allocation38_spill] sm:$0xff]  ;;  %v4181_v25 = vld [vmem:[#allocation39_spill] sm:$0xff] }
  0xe8   :  { %v3030_v38 = vpop.eup %1681  ;;  %v1210_v61 = vadd.f32 %v1209_v40, %v1003_v51  ;;  %1701 = vtanh.f32 %v2855_v60  ;;  %v330_v22 = vmul.f32 %v2186_v14, %v4178_v31  ;;  %v331_v17 = vmul.f32 %v2188_v15, %v4178_v31 }
  0xe9   :  { %v3037_v55 = vpop.eup %1683  ;;  %1703 = vtanh.f32 %v2875_v23  ;;  %v1234_v35 = vadd.f32 %v1233_v42, %v1024_v29  ;;  %v3042_v16 = vadd.f32 %v2190_v19, %v4180_v56  ;;  %v3046_v51 = vadd.f32 %v2192_v20, %v4181_v25  ;;  %v3057_v29 = vpop.permute.xlu0 %223  ;;  %v4185_v56 = vld [vmem:[#allocation66_spill] sm:$0xff] }
  0xea   :  { %4179 = vst [vmem:[#allocation30_spill] sm:$0xff] %v3037_v55  ;;  %v3048_v60 = vpop.eup %1685  ;;  %v1211_v58 = vadd.f32 %v1210_v61, %v1004_v30  ;;  %1705 = vtanh.f32 %v2884_v49  ;;  %v3052_v40 = vadd.f32 %v2194_v21, %v330_v22  ;;  %v3055_v31 = vadd.f32 %v2196_v26, %v331_v17  ;;  %4183 = vst [vmem:[#allocation32_spill] sm:$0xff] %v3057_v29  ;;  %v4186_v30 = vld [vmem:[#allocation67_spill] sm:$0xff]  ;;  %v4188_v17 = vld [vmem:[#allocation69_spill] sm:$0xff] }
  0xeb   :  { %4182 = vst [vmem:[#allocation31_spill] sm:$0xff] %v3048_v60  ;;  %v3059_v23 = vpop.eup %1687  ;;  %1707 = vtanh.f32 %v2887_v57  ;;  %v3062_v42 = vadd.f32 %v1234_v35, %v1025_v39  ;;  %v1030_v25 = vmul.f32 %v4185_v56, %v2198_v27  ;;  %v1031_v49 = vmul.f32 %v4186_v30, %v2200_v28 }
  0xec   :  { %4184 = vst [vmem:[#allocation26_spill] sm:$0xff] %v3059_v23  ;;  %v3068_v61 = vpop.eup %1689  ;;  %v1212_v22 = vadd.f32 %v1211_v58, %v1005_v47  ;;  %1709 = vtanh.f32 %v2895_v50  ;;  %v1032_v60 = vmul.f32 %v4188_v17, %v2202_v33  ;;  %v4189_v23 = vld [vmem:[#allocation71_spill] sm:$0xff]  ;;  %v452_v35 = vmul.f32 %v2166_v5, %v3057_v29 }
  0xed   :  { %4187 = vst [vmem:[#allocation43_spill] sm:$0xff] %v3068_v61  ;;  %v1033_v55 = vmul.f32 %v4189_v23, %v2204_v34  ;;  %v3075_v57 = vpop.eup %1691  ;;  %1711 = vtanh.f32 %v2936_v37  ;;  %v1242_v39 = vadd.f32 %v1031_v49, %v1030_v25  ;;  %v453_v56 = vmul.f32 %v2168_v6, %v3057_v29  ;;  %v3101_v49 = vpop.permute.xlu1 %238 }
  0xee   :  { %4190 = vst [vmem:[#allocation27_spill] sm:$0xff] %v3075_v57  ;;  %v3082_v47 = vpop.eup %1693  ;;  %1213 = vadd.xlane.f32.xlu0 %v1212_v22  ;;  %1713 = vtanh.f32 %v2942_v53  ;;  %v454_v50 = vmul.f32 %v2170_v7, %v3057_v29  ;;  %v455_v58 = vmul.f32 %v2172_v8, %v3057_v29  ;;  %v3091_v37 = vmul.f32 %v2174_v11, %v3057_v29 }
  0xef   :  { %4191 = vst [vmem:[#allocation45_spill] sm:$0xff] %v3082_v47  ;;  %v1696_v23 = vpop.eup %1695  ;;  %1715 = vtanh.f32 %v2945_v63  ;;  %v1243_v25 = vadd.f32 %v1242_v39, %v1032_v60  ;;  %v3096_v30 = vmul.f32 %v2176_v0, %v3057_v29  ;;  %v3099_v53 = vadd.f32 %v2178_v12, %v452_v35  ;;  %4194 = vst [vmem:[#allocation29_spill] sm:$0xff] %v3101_v49 }
  0xf0   :  { %4192 = vst [vmem:[#allocation28_spill] sm:$0xff] %v3091_v37  ;;  %v1698_v22 = vpop.eup %1697  ;;  %v1018_v17 = vmul.f32 %v1696_v23, %v4170_v10  ;;  %1717 = vtanh.f32 %v2948_v59  ;;  %v3106_v37 = vadd.f32 %v2180_v2, %v453_v56  ;;  %v3109_v63 = vadd.f32 %v2182_v13, %v454_v50 }
  0xf1   :  { %4193 = vst [vmem:[#allocation48_spill] sm:$0xff] %v3096_v30  ;;  %v1700_v60 = vpop.eup %1699  ;;  %v1019_v39 = vmul.f32 %v1698_v22, %v4172_v54  ;;  %1719 = vtanh.f32 %v2978_v9  ;;  %v3113_v35 = vadd.f32 %v1243_v25, %v1033_v55  ;;  %v3116_v30 = vadd.f32 %v2184_v4, %v455_v58 }
  0xf2   :  { %v1702_v29 = vpop.eup %1701  ;;  %v1020_v23 = vmul.f32 %v1700_v60, %v4174_v43  ;;  %v1227_v59 = vadd.f32 %v2911_v45, %v1018_v17  ;;  %1721 = vtanh.f32 %v2981_v1  ;;  %v476_v56 = vmul.f32 %v2166_v5, %v3101_v49 }
  0xf3   :  { %v1704_v50 = vpop.eup %1703  ;;  %v1021_v22 = vmul.f32 %v1702_v29, %v4176_v18  ;;  %1723 = vtanh.f32 %v2987_v36  ;;  %v477_v9 = vmul.f32 %v2168_v6, %v3101_v49  ;;  %v478_v55 = vmul.f32 %v2170_v7, %v3101_v49 }
  0xf4   :  { %v1706_v58 = vpop.eup %1705  ;;  %v1228_v25 = vadd.f32 %v1227_v59, %v1019_v39  ;;  %v1010_v45 = vmul.f32 %v1704_v50, %v4170_v10  ;;  %1725 = vtanh.f32 %v2990_v3  ;;  %v479_v1 = vmul.f32 %v2172_v8, %v3101_v49 }
  0xf5   :  { %v1708_v17 = vpop.eup %1707  ;;  %v1011_v29 = vmul.f32 %v1706_v58, %v4172_v54  ;;  %1727 = vtanh.f32 %v2999_v62  ;;  %v3137_v36 = vmul.f32 %v2174_v11, %v3101_v49  ;;  %v3141_v60 = vmul.f32 %v2176_v0, %v3101_v49 }
  0xf6   :  { %v1710_v39 = vpop.eup %1709  ;;  %v1229_v59 = vadd.f32 %v1228_v25, %v1020_v23  ;;  %v1012_v3 = vmul.f32 %v1708_v17, %v4174_v43  ;;  %v1218_v50 = vadd.f32 %v2953_v24, %v1010_v45  ;;  %1729 = vtanh.f32 %v3003_v46  ;;  %v4198_v45 = vld [vmem:[#allocation33_spill] sm:$0xff]  ;;  %v4201_v17 = vld [vmem:[#allocation36_spill] sm:$0xff] }
  0xf7   :  { %4195 = vst [vmem:[#allocation49_spill] sm:$0xff] %v3137_v36  ;;  %4196 = vst [vmem:[#allocation34_spill] sm:$0xff] %v3141_v60  ;;  %v3146_v47 = vpop.eup %1711  ;;  %v1013_v62 = vmul.f32 %v1710_v39, %v4176_v18  ;;  %1731 = vtanh.f32 %v3008_v41  ;;  %v725_v58 = vadd.f32 %v2178_v12, %v476_v56  ;;  %v726_v36 = vadd.f32 %v2180_v2, %v477_v9 }
  0xf8   :  { %v3152_v49 = vpop.eup %1713  ;;  %v1230_v60 = vadd.f32 %v1229_v59, %v1021_v22  ;;  %v1219_v23 = vadd.f32 %v1218_v50, %v1011_v29  ;;  %1733 = vtanh.f32 %v3015_v32  ;;  %v727_v24 = vadd.f32 %v2182_v13, %v478_v55  ;;  %v4200_v32 = vld [vmem:[#allocation35_spill] sm:$0xff]  ;;  %v4205_v50 = vld [vmem:[#allocation60_spill] sm:$0xff] }
  0xf9   :  { %v3156_v25 = vpop.eup %1715  ;;  %1735 = vtanh.f32 %v3042_v16  ;;  %v728_v46 = vadd.f32 %v2184_v4, %v479_v1  ;;  %v338_v41 = vmul.f32 %v2186_v14, %v4198_v45  ;;  %v339_v56 = vmul.f32 %v2188_v15, %v4198_v45  ;;  %v4206_v45 = vld [vmem:[#allocation61_spill] sm:$0xff] }
  0xfa   :  { %4197 = vst [vmem:[#allocation38_spill] sm:$0xff] %v3156_v25  ;;  %v3164_v9 = vpop.eup %1717  ;;  %1231 = vadd.xlane.f32.xlu0 %v1230_v60  ;;  %v1220_v22 = vadd.f32 %v1219_v23, %v1012_v3  ;;  %1737 = vtanh.f32 %v3046_v51  ;;  %v585_v55 = vadd.f32 %v2190_v19, %v4200_v32  ;;  %v586_v16 = vadd.f32 %v2192_v20, %v4201_v17  ;;  %v4203_v60 = vld [vmem:[#allocation57_spill] sm:$0xff]  ;;  %v4209_v17 = vld [vmem:[#allocation40_spill] sm:$0xff] }
  0xfb   :  { %4199 = vst [vmem:[#allocation39_spill] sm:$0xff] %v3164_v9  ;;  %v3171_v29 = vpop.eup %1719  ;;  %1739 = vtanh.f32 %v3052_v40  ;;  %v587_v1 = vadd.f32 %v2194_v21, %v338_v41  ;;  %v3176_v39 = vadd.f32 %v2196_v26, %v339_v56  ;;  %v1038_v59 = vmul.f32 %v4203_v60, %v2198_v27  ;;  %v4208_v41 = vld [vmem:[#allocation63_spill] sm:$0xff] }
  0xfc   :  { %4202 = vst [vmem:[#allocation66_spill] sm:$0xff] %v3171_v29  ;;  %v3180_v3 = vpop.eup %1721  ;;  %v1221_v51 = vadd.f32 %v1220_v22, %v1013_v62  ;;  %1741 = vtanh.f32 %v3055_v31  ;;  %v1039_v23 = vmul.f32 %v4205_v50, %v2200_v28  ;;  %v1040_v32 = vmul.f32 %v4206_v45, %v2202_v33  ;;  %v4211_v50 = vld [vmem:[#allocation46_spill] sm:$0xff] }
  0xfd   :  { %4204 = vst [vmem:[#allocation67_spill] sm:$0xff] %v3180_v3  ;;  %v3187_v40 = vpop.eup %1723  ;;  %1743 = vtanh.f32 %v3099_v53  ;;  %v1041_v56 = vmul.f32 %v4208_v41, %v2204_v34  ;;  %v346_v60 = vmul.f32 %v2186_v14, %v4209_v17  ;;  %v347_v62 = vmul.f32 %v2188_v15, %v4209_v17  ;;  %v4213_v17 = vld [vmem:[#allocation80_spill] sm:$0xff] }
  0xfe   :  { %4207 = vst [vmem:[#allocation69_spill] sm:$0xff] %v3187_v40  ;;  %v3196_v31 = vpop.eup %1725  ;;  %1222 = vadd.xlane.f32.xlu1 %v1221_v51  ;;  %1745 = vtanh.f32 %v3106_v37  ;;  %v1251_v22 = vadd.f32 %v1039_v23, %v1038_v59  ;;  %v593_v45 = vadd.f32 %v2190_v19, %v4211_v50  ;;  %v4212_v40 = vld [vmem:[#allocation47_spill] sm:$0xff]  ;;  %v1046_v51 = vmul.f32 %v4213_v17, %v2198_v27  ;;  %v4214_v23 = vld [vmem:[#allocation82_spill] sm:$0xff]  ;;  %v3214_v50 = vpop.permute.xlu0 %233 }
  0xff   :  { %4210 = vst [vmem:[#allocation71_spill] sm:$0xff] %v3196_v31  ;;  %v594_v53 = vadd.f32 %v2192_v20, %v4212_v40  ;;  %v1728_v3 = vpop.eup %1727  ;;  %1747 = vtanh.f32 %v3109_v63  ;;  %v595_v41 = vadd.f32 %v2194_v21, %v346_v60  ;;  %v3206_v29 = vadd.f32 %v2196_v26, %v347_v62  ;;  %v4215_v62 = vld [vmem:[#allocation85_spill] sm:$0xff]  ;;  %v4216_v17 = vld [vmem:[#allocation86_spill] sm:$0xff] }
 0x100   :  { %v1730_v31 = vpop.eup %1729  ;;  %v1026_v37 = vmul.f32 %v1728_v3, %v4170_v10  ;;  %1749 = vtanh.f32 %v3116_v30  ;;  %v1252_v59 = vadd.f32 %v1251_v22, %v1040_v32  ;;  %v1047_v40 = vmul.f32 %v4214_v23, %v2200_v28 }
 0x101   :  { %v1732_v63 = vpop.eup %1731  ;;  %v1027_v60 = vmul.f32 %v1730_v31, %v4172_v54  ;;  %1751 = vtanh.f32 %v725_v58  ;;  %v1048_v57 = vmul.f32 %v4215_v62, %v2202_v33  ;;  %v1049_v61 = vmul.f32 %v4216_v17, %v2204_v34 }
 0x102   :  { %v1734_v9 = vpop.eup %1733  ;;  %v1028_v3 = vmul.f32 %v1732_v63, %v4174_v43  ;;  %v1236_v30 = vadd.f32 %v3062_v42, %v1026_v37  ;;  %1753 = vtanh.f32 %v726_v36  ;;  %v3223_v32 = vadd.f32 %v1252_v59, %v1041_v56 }
 0x103   :  { %v1736_v22 = vpop.eup %1735  ;;  %v1029_v23 = vmul.f32 %v1734_v9, %v4176_v18  ;;  %1755 = vtanh.f32 %v727_v24  ;;  %v1260_v31 = vadd.f32 %v1047_v40, %v1046_v51  ;;  %v468_v58 = vmul.f32 %v2166_v5, %v3214_v50 }
 0x104   :  { %v1738_v62 = vpop.eup %1737  ;;  %v1237_v25 = vadd.f32 %v1236_v30, %v1027_v60  ;;  %v1034_v17 = vmul.f32 %v1736_v22, %v4170_v10  ;;  %1757 = vtanh.f32 %v728_v46  ;;  %v469_v63 = vmul.f32 %v2168_v6, %v3214_v50 }
 0x105   :  { %v1740_v42 = vpop.eup %1739  ;;  %v1035_v36 = vmul.f32 %v1738_v62, %v4172_v54  ;;  %1759 = vtanh.f32 %v585_v55  ;;  %v1261_v56 = vadd.f32 %v1260_v31, %v1048_v57  ;;  %v470_v24 = vmul.f32 %v2170_v7, %v3214_v50 }
 0x106   :  { %v1742_v9 = vpop.eup %1741  ;;  %v1238_v51 = vadd.f32 %v1237_v25, %v1028_v3  ;;  %v1036_v37 = vmul.f32 %v1740_v42, %v4174_v43  ;;  %v1245_v59 = vadd.f32 %v3113_v35, %v1034_v17  ;;  %1761 = vtanh.f32 %v586_v16  ;;  %v3250_v25 = vpop.permute.xlu1 %248 }
 0x107   :  { %v3236_v40 = vpop.eup %1743  ;;  %v1037_v46 = vmul.f32 %v1742_v9, %v4176_v18  ;;  %1763 = vtanh.f32 %v587_v1  ;;  %v3239_v60 = vadd.f32 %v1261_v56, %v1049_v61  ;;  %v471_v57 = vmul.f32 %v2172_v8, %v3214_v50  ;;  %4217 = vst [vmem:[#allocation33_spill] sm:$0xff] %v3250_v25 }
 0x108   :  { %v3243_v55 = vpop.eup %1745  ;;  %v1239_v30 = vadd.f32 %v1238_v51, %v1029_v23  ;;  %v1246_v22 = vadd.f32 %v1245_v59, %v1035_v36  ;;  %1765 = vtanh.f32 %v3176_v39  ;;  %v3248_v35 = vmul.f32 %v2174_v11, %v3214_v50 }
 0x109   :  { %v3252_v16 = vpop.eup %1747  ;;  %1767 = vtanh.f32 %v593_v45  ;;  %v3256_v61 = vmul.f32 %v2176_v0, %v3214_v50  ;;  %v717_v1 = vadd.f32 %v2178_v12, %v468_v58  ;;  %v718_v3 = vadd.f32 %v2180_v2, %v469_v63 }
 0x10a   :  { %v3260_v23 = vpop.eup %1749  ;;  %1240 = vadd.xlane.f32.xlu0 %v1239_v30  ;;  %v1247_v39 = vadd.f32 %v1246_v22, %v1036_v37  ;;  %1769 = vtanh.f32 %v594_v53  ;;  %v719_v31 = vadd.f32 %v2182_v13, %v470_v24  ;;  %v720_v62 = vadd.f32 %v2184_v4, %v471_v57 }
 0x10b   :  { %4218 = vst [vmem:[#allocation35_spill] sm:$0xff] %v3256_v61  ;;  %v3264_v17 = vpop.eup %1751  ;;  %1771 = vtanh.f32 %v595_v41  ;;  %v492_v45 = vmul.f32 %v2166_v5, %v3250_v25  ;;  %v493_v58 = vmul.f32 %v2168_v6, %v3250_v25  ;;  %v494_v63 = vmul.f32 %v2170_v7, %v3250_v25 }
 0x10c   :  { %4219 = vst [vmem:[#allocation36_spill] sm:$0xff] %v3264_v17  ;;  %v3272_v42 = vpop.eup %1753  ;;  %v1248_v36 = vadd.f32 %v1247_v39, %v1037_v46  ;;  %1773 = vtanh.f32 %v3206_v29  ;;  %v495_v53 = vmul.f32 %v2172_v8, %v3250_v25  ;;  %v3279_v41 = vmul.f32 %v2174_v11, %v3250_v25  ;;  %v4225_v46 = vld [vmem:[#allocation37_spill] sm:$0xff] }
 0x10d   :  { %4220 = vst [vmem:[#allocation57_spill] sm:$0xff] %v3272_v42  ;;  %v3281_v56 = vpop.eup %1755  ;;  %1775 = vtanh.f32 %v717_v1  ;;  %v3285_v24 = vmul.f32 %v2176_v0, %v3250_v25  ;;  %v741_v9 = vadd.f32 %v2178_v12, %v492_v45  ;;  %v742_v51 = vadd.f32 %v2180_v2, %v493_v58  ;;  %v4226_v1 = vld [vmem:[#allocation41_spill] sm:$0xff]  ;;  %v4227_v45 = vld [vmem:[#allocation42_spill] sm:$0xff] }
 0x10e   :  { %4221 = vst [vmem:[#allocation60_spill] sm:$0xff] %v3279_v41  ;;  %4222 = vst [vmem:[#allocation61_spill] sm:$0xff] %v3281_v56  ;;  %v3289_v37 = vpop.eup %1757  ;;  %1249 = vadd.xlane.f32.xlu1 %v1248_v36  ;;  %1777 = vtanh.f32 %v718_v3  ;;  %v743_v29 = vadd.f32 %v2182_v13, %v494_v63  ;;  %v744_v59 = vadd.f32 %v2184_v4, %v495_v53  ;;  %v4228_v53 = vld [vmem:[#allocation73_spill] sm:$0xff] }
 0x10f   :  { %4223 = vst [vmem:[#allocation63_spill] sm:$0xff] %v3285_v24  ;;  %4224 = vst [vmem:[#allocation40_spill] sm:$0xff] %v3289_v37  ;;  %v354_v57 = vmul.f32 %v2186_v14, %v4225_v46  ;;  %v1760_v30 = vpop.eup %1759  ;;  %1779 = vtanh.f32 %v719_v31  ;;  %v355_v22 = vmul.f32 %v2188_v15, %v4225_v46  ;;  %v601_v39 = vadd.f32 %v2190_v19, %v4226_v1  ;;  %v4229_v1 = vld [vmem:[#allocation74_spill] sm:$0xff] }
 0x110   :  { %v602_v58 = vadd.f32 %v2192_v20, %v4227_v45  ;;  %v1762_v36 = vpop.eup %1761  ;;  %v1042_v3 = vmul.f32 %v1760_v30, %v4170_v10  ;;  %1781 = vtanh.f32 %v720_v62  ;;  %v1054_v24 = vmul.f32 %v4228_v53, %v2198_v27  ;;  %v4230_v62 = vld [vmem:[#allocation76_spill] sm:$0xff] }
 0x111   :  { %v603_v63 = vadd.f32 %v2194_v21, %v354_v57  ;;  %v1764_v41 = vpop.eup %1763  ;;  %v1043_v31 = vmul.f32 %v1762_v36, %v4172_v54  ;;  %1783 = vtanh.f32 %v741_v9  ;;  %v604_v46 = vadd.f32 %v2196_v26, %v355_v22  ;;  %v4231_v9 = vld [vmem:[#allocation79_spill] sm:$0xff] }
 0x112   :  { %v1055_v25 = vmul.f32 %v4229_v1, %v2200_v28  ;;  %v1766_v37 = vpop.eup %1765  ;;  %v1044_v45 = vmul.f32 %v1764_v41, %v4174_v43  ;;  %v1254_v30 = vadd.f32 %v3223_v32, %v1042_v3  ;;  %1785 = vtanh.f32 %v742_v51  ;;  %v4232_v41 = vld [vmem:[#allocation50_spill] sm:$0xff] }
 0x113   :  { %v1056_v57 = vmul.f32 %v4230_v62, %v2202_v33  ;;  %v1768_v56 = vpop.eup %1767  ;;  %v1045_v53 = vmul.f32 %v1766_v37, %v4176_v18  ;;  %1787 = vtanh.f32 %v743_v29  ;;  %v1057_v36 = vmul.f32 %v4231_v9, %v2204_v34 }
 0x114   :  { %v1269_v22 = vadd.f32 %v1055_v25, %v1054_v24  ;;  %v1770_v42 = vpop.eup %1769  ;;  %v1255_v17 = vadd.f32 %v1254_v30, %v1043_v31  ;;  %v1050_v1 = vmul.f32 %v1768_v56, %v4170_v10  ;;  %1789 = vtanh.f32 %v744_v59  ;;  %v4233_v30 = vld [vmem:[#allocation58_spill] sm:$0xff] }
 0x115   :  { %v362_v32 = vmul.f32 %v2186_v14, %v4232_v41  ;;  %v1772_v51 = vpop.eup %1771  ;;  %v1051_v3 = vmul.f32 %v1770_v42, %v4172_v54  ;;  %1791 = vtanh.f32 %v601_v39  ;;  %v363_v37 = vmul.f32 %v2188_v15, %v4232_v41 }
 0x116   :  { %v1270_v62 = vadd.f32 %v1269_v22, %v1056_v57  ;;  %v1774_v29 = vpop.eup %1773  ;;  %v1256_v61 = vadd.f32 %v1255_v17, %v1044_v45  ;;  %v1052_v25 = vmul.f32 %v1772_v51, %v4174_v43  ;;  %v1263_v24 = vadd.f32 %v3239_v60, %v1050_v1  ;;  %v4234_v17 = vld [vmem:[#allocation59_spill] sm:$0xff]  ;;  %v3333_v22 = vpop.permute.xlu0 %243 }
 0x117   :  { %1793 = vtanh.f32 %v602_v58  ;;  %v3324_v56 = vpop.eup %1775  ;;  %v1053_v59 = vmul.f32 %v1774_v29, %v4176_v18  ;;  %v609_v42 = vadd.f32 %v2190_v19, %v4233_v30  ;;  %v610_v45 = vadd.f32 %v2192_v20, %v4234_v17  ;;  %v4237_v51 = vld [vmem:[#allocation99_spill] sm:$0xff] }
 0x118   :  { %1795 = vtanh.f32 %v603_v63  ;;  %v1271_v31 = vadd.f32 %v1270_v62, %v1057_v36  ;;  %v3329_v39 = vpop.eup %1777  ;;  %v1257_v57 = vadd.f32 %v1256_v61, %v1045_v53  ;;  %v1264_v9 = vadd.f32 %v1263_v24, %v1051_v3  ;;  %v4235_v36 = vld [vmem:[#allocation95_spill] sm:$0xff] }
 0x119   :  { %1797 = vtanh.f32 %v604_v46  ;;  %v3335_v60 = vpop.eup %1779  ;;  %v611_v58 = vadd.f32 %v2194_v21, %v362_v32  ;;  %v612_v63 = vadd.f32 %v2196_v26, %v363_v37  ;;  %v1062_v1 = vmul.f32 %v4235_v36, %v2198_v27  ;;  %v4236_v46 = vld [vmem:[#allocation98_spill] sm:$0xff]  ;;  %v4238_v32 = vld [vmem:[#allocation100_spill] sm:$0xff] }
 0x11a   :  { %1799 = vtanh.f32 %v609_v42  ;;  %v3341_v41 = vpop.eup %1781  ;;  %1258 = vadd.xlane.f32.xlu0 %v1257_v57  ;;  %v1265_v61 = vadd.f32 %v1264_v9, %v1052_v25  ;;  %v1063_v53 = vmul.f32 %v4236_v46, %v2200_v28  ;;  %v1064_v3 = vmul.f32 %v4237_v51, %v2202_v33  ;;  %v4241_v36 = vld [vmem:[#allocation44_spill] sm:$0xff] }
 0x11b   :  { %1801 = vtanh.f32 %v610_v45  ;;  %v3347_v62 = vpop.eup %1783  ;;  %v1065_v37 = vmul.f32 %v4238_v32, %v2204_v34  ;;  %v484_v29 = vmul.f32 %v2166_v5, %v3333_v22  ;;  %v485_v24 = vmul.f32 %v2168_v6, %v3333_v22 }
 0x11c   :  { %1803 = vtanh.f32 %v611_v58  ;;  %v3355_v25 = vpop.eup %1785  ;;  %v1266_v30 = vadd.f32 %v1265_v61, %v1053_v59  ;;  %v1278_v42 = vadd.f32 %v1063_v53, %v1062_v1  ;;  %v486_v57 = vmul.f32 %v2170_v7, %v3333_v22  ;;  %v4242_v61 = vld [vmem:[#allocation51_spill] sm:$0xff] }
 0x11d   :  { %1805 = vtanh.f32 %v612_v63  ;;  %v3359_v9 = vpop.eup %1787  ;;  %v487_v17 = vmul.f32 %v2172_v8, %v3333_v22  ;;  %v3365_v45 = vmul.f32 %v2174_v11, %v3333_v22  ;;  %v3369_v5 = vmul.f32 %v2176_v0, %v3333_v22 }
 0x11e   :  { %4239 = vst [vmem:[#allocation46_spill] sm:$0xff] %v3359_v9  ;;  %v733_v6 = vadd.f32 %v2178_v12, %v484_v29  ;;  %v3372_v59 = vpop.eup %1789  ;;  %1267 = vadd.xlane.f32.xlu1 %v1266_v30  ;;  %v1279_v58 = vadd.f32 %v1278_v42, %v1064_v3  ;;  %v734_v7 = vadd.f32 %v2180_v2, %v485_v24  ;;  %v4243_v2 = vld [vmem:[#allocation53_spill] sm:$0xff] }
 0x11f   :  { %4240 = vst [vmem:[#allocation47_spill] sm:$0xff] %v3372_v59  ;;  %v735_v63 = vadd.f32 %v2182_v13, %v486_v57  ;;  %v370_v8 = vmul.f32 %v2186_v14, %v4241_v36  ;;  %v1792_v1 = vpop.eup %1791  ;;  %v736_v11 = vadd.f32 %v2184_v4, %v487_v17  ;;  %v371_v0 = vmul.f32 %v2188_v15, %v4241_v36  ;;  %v4244_v57 = vld [vmem:[#allocation88_spill] sm:$0xff] }
 0x120   :  { %1807 = vtanh.f32 %v733_v6  ;;  %v617_v12 = vadd.f32 %v2190_v19, %v4242_v61  ;;  %v1058_v53 = vmul.f32 %v1792_v1, %v4170_v10  ;;  %v1280_v51 = vadd.f32 %v1279_v58, %v1065_v37  ;;  %v4245_v58 = vld [vmem:[#allocation90_spill] sm:$0xff] }
 0x121   :  { %v1794_v46 = vpop.eup %1793  ;;  %1809 = vtanh.f32 %v734_v7  ;;  %v618_v13 = vadd.f32 %v2192_v20, %v4243_v2  ;;  %v619_v4 = vadd.f32 %v2194_v21, %v370_v8  ;;  %v620_v29 = vadd.f32 %v2196_v26, %v371_v0 }
 0x122   :  { %v1796_v3 = vpop.eup %1795  ;;  %v1059_v32 = vmul.f32 %v1794_v46, %v4172_v54  ;;  %1811 = vtanh.f32 %v735_v63  ;;  %v1272_v42 = vadd.f32 %v1271_v31, %v1058_v53  ;;  %v1070_v37 = vmul.f32 %v4244_v57, %v2198_v27  ;;  %v4246_v63 = vld [vmem:[#allocation92_spill] sm:$0xff]  ;;  %v4247_v31 = vld [vmem:[#allocation93_spill] sm:$0xff] }
 0x123   :  { %v1798_v24 = vpop.eup %1797  ;;  %v1060_v30 = vmul.f32 %v1796_v3, %v4174_v43  ;;  %1813 = vtanh.f32 %v736_v11  ;;  %v1071_v7 = vmul.f32 %v4245_v58, %v2200_v28  ;;  %v1072_v36 = vmul.f32 %v4246_v63, %v2202_v33 }
 0x124   :  { %v1800_v17 = vpop.eup %1799  ;;  %v1061_v6 = vmul.f32 %v1798_v24, %v4176_v18  ;;  %1815 = vtanh.f32 %v617_v12  ;;  %v1273_v1 = vadd.f32 %v1272_v42, %v1059_v32  ;;  %v1073_v11 = vmul.f32 %v4247_v31, %v2204_v34  ;;  %v4248_v12 = vld [vmem:[#allocation62_spill] sm:$0xff] }
 0x125   :  { %v1802_v8 = vpop.eup %1801  ;;  %v1066_v0 = vmul.f32 %v1800_v17, %v4170_v10  ;;  %1817 = vtanh.f32 %v618_v13  ;;  %v1287_v53 = vadd.f32 %v1071_v7, %v1070_v37  ;;  %v378_v2 = vmul.f32 %v2186_v14, %v4248_v12  ;;  %v4249_v17 = vld [vmem:[#allocation70_spill] sm:$0xff]  ;;  %v4250_v7 = vld [vmem:[#allocation72_spill] sm:$0xff] }
 0x126   :  { %v1804_v61 = vpop.eup %1803  ;;  %v1067_v46 = vmul.f32 %v1802_v8, %v4172_v54  ;;  %1819 = vtanh.f32 %v619_v4  ;;  %v1274_v24 = vadd.f32 %v1273_v1, %v1060_v30  ;;  %v379_v42 = vmul.f32 %v2188_v15, %v4248_v12 }
 0x127   :  { %v1806_v3 = vpop.eup %1805  ;;  %v1068_v57 = vmul.f32 %v1804_v61, %v4174_v43  ;;  %v1281_v58 = vadd.f32 %v1280_v51, %v1066_v0  ;;  %1821 = vtanh.f32 %v620_v29  ;;  %v1288_v13 = vadd.f32 %v1287_v53, %v1072_v36  ;;  %v4251_v61 = vld [vmem:[#allocation109_spill] sm:$0xff] }
 0x128   :  { %v1069_v32 = vmul.f32 %v1806_v3, %v4176_v18  ;;  %v625_v63 = vadd.f32 %v2190_v19, %v4249_v17  ;;  %v1275_v4 = vadd.f32 %v1274_v24, %v1061_v6  ;;  %v626_v8 = vadd.f32 %v2192_v20, %v4250_v7  ;;  %v4255_v17 = vld [vmem:[#allocation65_spill] sm:$0xff]  ;;  %v4256_v7 = vld [vmem:[#allocation103_spill] sm:$0xff] }
 0x129   :  { %v1282_v37 = vadd.f32 %v1281_v58, %v1067_v46  ;;  %v627_v30 = vadd.f32 %v2194_v21, %v378_v2  ;;  %v1289_v51 = vadd.f32 %v1288_v13, %v1073_v11  ;;  %v628_v29 = vadd.f32 %v2196_v26, %v379_v42  ;;  %v4252_v11 = vld [vmem:[#allocation112_spill] sm:$0xff] }
 0x12a   :  { %v3412_v1 = vpop.eup %1807  ;;  %1823 = vtanh.f32 %v625_v63  ;;  %v1078_v36 = vmul.f32 %v2740_v48, %v2198_v27  ;;  %1276 = vadd.xlane.f32.xlu0 %v1275_v4  ;;  %v1079_v6 = vmul.f32 %v2749_v52, %v2200_v28  ;;  %v1080_v46 = vmul.f32 %v4251_v61, %v2202_v33  ;;  %v4253_v2 = vld [vmem:[#allocation56_spill] sm:$0xff] }
 0x12b   :  { %v3417_v0 = vpop.eup %1809  ;;  %v1283_v31 = vadd.f32 %v1282_v37, %v1068_v57  ;;  %1825 = vtanh.f32 %v626_v8  ;;  %v1081_v12 = vmul.f32 %v4252_v11, %v2204_v34  ;;  %v386_v48 = vmul.f32 %v2186_v14, %v4253_v2  ;;  %v4254_v58 = vld [vmem:[#allocation64_spill] sm:$0xff]  ;;  %v4258_v11 = vld [vmem:[#allocation106_spill] sm:$0xff] }
 0x12c   :  { %v3423_v53 = vpop.eup %1811  ;;  %1827 = vtanh.f32 %v627_v30  ;;  %v387_v3 = vmul.f32 %v2188_v15, %v4253_v2  ;;  %v1296_v52 = vadd.f32 %v1079_v6, %v1078_v36  ;;  %v633_v13 = vadd.f32 %v2190_v19, %v4254_v58  ;;  %v4257_v36 = vld [vmem:[#allocation104_spill] sm:$0xff] }
 0x12d   :  { %v3431_v24 = vpop.eup %1813  ;;  %v1284_v57 = vadd.f32 %v1283_v31, %v1069_v32  ;;  %1829 = vtanh.f32 %v628_v29  ;;  %v634_v63 = vadd.f32 %v2192_v20, %v4255_v17  ;;  %v635_v4 = vadd.f32 %v2194_v21, %v386_v48  ;;  %v4259_v48 = vld [vmem:[#allocation107_spill] sm:$0xff] }
 0x12e   :  { %v1816_v42 = vpop.eup %1815  ;;  %v636_v37 = vadd.f32 %v2196_v26, %v387_v3  ;;  %v1086_v8 = vmul.f32 %v4256_v7, %v2198_v27  ;;  %v1297_v29 = vadd.f32 %v1296_v52, %v1080_v46  ;;  %1831 = vtanh.f32 %v633_v13  ;;  %v4260_v13 = vld [vmem:[#allocation75_spill] sm:$0xff] }
 0x12f   :  { %v1818_v30 = vpop.eup %1817  ;;  %1285 = vadd.xlane.f32.xlu1 %v1284_v57  ;;  %v1074_v32 = vmul.f32 %v1816_v42, %v4170_v10  ;;  %v1087_v31 = vmul.f32 %v4257_v36, %v2200_v28  ;;  %1833 = vtanh.f32 %v634_v63  ;;  %v1088_v2 = vmul.f32 %v4258_v11, %v2202_v33  ;;  %v4261_v36 = vld [vmem:[#allocation83_spill] sm:$0xff] }
 0x130   :  { %v1820_v6 = vpop.eup %1819  ;;  %v1075_v61 = vmul.f32 %v1818_v30, %v4172_v54  ;;  %v1089_v3 = vmul.f32 %v4259_v48, %v2204_v34  ;;  %v1298_v42 = vadd.f32 %v1297_v29, %v1081_v12  ;;  %1835 = vtanh.f32 %v635_v4  ;;  %v4262_v48 = vld [vmem:[#allocation84_spill] sm:$0xff] }
 0x131   :  { %v1822_v58 = vpop.eup %1821  ;;  %v1076_v57 = vmul.f32 %v1820_v6, %v4174_v43  ;;  %v1290_v17 = vadd.f32 %v1289_v51, %v1074_v32  ;;  %1837 = vtanh.f32 %v636_v37  ;;  %v1305_v52 = vadd.f32 %v1087_v31, %v1086_v8  ;;  %v4263_v37 = vld [vmem:[#allocation119_spill] sm:$0xff]  ;;  %v4264_v32 = vld [vmem:[#allocation120_spill] sm:$0xff] }
 0x132   :  { %v1077_v46 = vmul.f32 %v1822_v58, %v4176_v18  ;;  %v394_v7 = vmul.f32 %v2186_v14, %v4260_v13  ;;  %v395_v30 = vmul.f32 %v2188_v15, %v4260_v13  ;;  %v641_v11 = vadd.f32 %v2190_v19, %v4261_v36 }
 0x133   :  { %v1291_v63 = vadd.f32 %v1290_v17, %v1075_v61  ;;  %v642_v6 = vadd.f32 %v2192_v20, %v4262_v48  ;;  %v1306_v12 = vadd.f32 %v1305_v52, %v1088_v2  ;;  %v1094_v8 = vmul.f32 %v4263_v37, %v2198_v27  ;;  %v4265_v2 = vld [vmem:[#allocation121_spill] sm:$0xff] }
 0x134   :  { %v1824_v51 = vpop.eup %1823  ;;  %v643_v4 = vadd.f32 %v2194_v21, %v394_v7  ;;  %v1095_v29 = vmul.f32 %v4264_v32, %v2200_v28  ;;  %v644_v17 = vadd.f32 %v2196_v26, %v395_v30  ;;  %1839 = vtanh.f32 %v641_v11 }
 0x135   :  { %v1826_v31 = vpop.eup %1825  ;;  %v1292_v61 = vadd.f32 %v1291_v63, %v1076_v57  ;;  %v1082_v58 = vmul.f32 %v1824_v51, %v4170_v10  ;;  %v1307_v48 = vadd.f32 %v1306_v12, %v1089_v3  ;;  %1841 = vtanh.f32 %v642_v6  ;;  %v4266_v63 = vld [vmem:[#allocation122_spill] sm:$0xff]  ;;  %v4267_v6 = vld [vmem:[#allocation68_spill] sm:$0xff] }
 0x136   :  { %v1828_v13 = vpop.eup %1827  ;;  %v1083_v36 = vmul.f32 %v1826_v31, %v4172_v54  ;;  %v1096_v52 = vmul.f32 %v4265_v2, %v2202_v33  ;;  %1843 = vtanh.f32 %v643_v4  ;;  %v1097_v30 = vmul.f32 %v4266_v63, %v2204_v34  ;;  %v4268_v31 = vld [vmem:[#allocation77_spill] sm:$0xff] }
 0x137   :  { %v1830_v7 = vpop.eup %1829  ;;  %v1293_v37 = vadd.f32 %v1292_v61, %v1077_v46  ;;  %v1084_v59 = vmul.f32 %v1828_v13, %v4174_v43  ;;  %v1299_v32 = vadd.f32 %v1298_v42, %v1082_v58  ;;  %1845 = vtanh.f32 %v644_v17  ;;  %v4269_v17 = vld [vmem:[#allocation78_spill] sm:$0xff] }
 0x138   :  { %v1085_v57 = vmul.f32 %v1830_v7, %v4176_v18  ;;  %v1314_v11 = vadd.f32 %v1095_v29, %v1094_v8  ;;  %v1832_v51 = vpop.eup %1831  ;;  %v402_v12 = vmul.f32 %v2186_v14, %v4267_v6  ;;  %v403_v46 = vmul.f32 %v2188_v15, %v4267_v6  ;;  %v4270_v8 = vld [vmem:[#allocation113_spill] sm:$0xff] }
 0x139   :  { %1294 = vadd.xlane.f32.xlu0 %v1293_v37  ;;  %v1300_v3 = vadd.f32 %v1299_v32, %v1083_v36  ;;  %v649_v42 = vadd.f32 %v2190_v19, %v4268_v31  ;;  %v1834_v4 = vpop.eup %1833  ;;  %v1090_v61 = vmul.f32 %v1832_v51, %v4170_v10  ;;  %v650_v13 = vadd.f32 %v2192_v20, %v4269_v17  ;;  %v4271_v17 = vld [vmem:[#allocation114_spill] sm:$0xff] }
 0x13a   :  { %v1315_v58 = vadd.f32 %v1314_v11, %v1096_v52  ;;  %v1102_v29 = vmul.f32 %v4270_v8, %v2198_v27  ;;  %v1836_v36 = vpop.eup %1835  ;;  %v1091_v7 = vmul.f32 %v1834_v4, %v4172_v54  ;;  %v651_v37 = vadd.f32 %v2194_v21, %v402_v12 }
 0x13b   :  { %v1301_v2 = vadd.f32 %v1300_v3, %v1084_v59  ;;  %v652_v32 = vadd.f32 %v2196_v26, %v403_v46  ;;  %v1838_v63 = vpop.eup %1837  ;;  %v1092_v6 = vmul.f32 %v1836_v36, %v4174_v43  ;;  %v1308_v31 = vadd.f32 %v1307_v48, %v1090_v61  ;;  %v4272_v3 = vld [vmem:[#allocation115_spill] sm:$0xff]  ;;  %v4273_v46 = vld [vmem:[#allocation118_spill] sm:$0xff]  ;;  %v4275_v36 = vld [vmem:[#allocation96_spill] sm:$0xff] }
 0x13c   :  { %v1316_v51 = vadd.f32 %v1315_v58, %v1097_v30  ;;  %1847 = vtanh.f32 %v649_v42  ;;  %v1093_v11 = vmul.f32 %v1838_v63, %v4176_v18  ;;  %v1103_v8 = vmul.f32 %v4271_v17, %v2200_v28  ;;  %v4274_v30 = vld [vmem:[#allocation87_spill] sm:$0xff] }
 0x13d   :  { %v1302_v52 = vadd.f32 %v1301_v2, %v1085_v57  ;;  %1849 = vtanh.f32 %v650_v13  ;;  %v1309_v59 = vadd.f32 %v1308_v31, %v1091_v7  ;;  %v1104_v12 = vmul.f32 %v4272_v3, %v2202_v33  ;;  %v4276_v7 = vld [vmem:[#allocation97_spill] sm:$0xff] }
 0x13e   :  { %1851 = vtanh.f32 %v651_v37  ;;  %v1105_v4 = vmul.f32 %v4273_v46, %v2204_v34  ;;  %v1840_v9 = vpop.eup %1839  ;;  %v1323_v48 = vadd.f32 %v1103_v8, %v1102_v29  ;;  %v410_v57 = vmul.f32 %v2186_v14, %v4274_v30  ;;  %v4277_v46 = vld [vmem:[#allocation54_spill] sm:$0xff] }
 0x13f   :  { %1303 = vadd.xlane.f32.xlu1 %v1302_v52  ;;  %1853 = vtanh.f32 %v652_v32  ;;  %v411_v42 = vmul.f32 %v2188_v15, %v4274_v30  ;;  %v1842_v61 = vpop.eup %1841  ;;  %v1310_v58 = vadd.f32 %v1309_v59, %v1092_v6  ;;  %v1098_v13 = vmul.f32 %v1840_v9, %v4170_v10 }
 0x140   :  { %v657_v2 = vadd.f32 %v2190_v19, %v4275_v36  ;;  %v658_v37 = vadd.f32 %v2192_v20, %v4276_v7  ;;  %v1844_v63 = vpop.eup %1843  ;;  %v1099_v32 = vmul.f32 %v1842_v61, %v4172_v54  ;;  %v1324_v29 = vadd.f32 %v1323_v48, %v1104_v12  ;;  %v4278_v12 = vld [vmem:[#allocation55_spill] sm:$0xff] }
 0x141   :  { %v659_v31 = vadd.f32 %v2194_v21, %v410_v57  ;;  %v660_v52 = vadd.f32 %v2196_v26, %v411_v42  ;;  %v1846_v17 = vpop.eup %1845  ;;  %v1311_v8 = vadd.f32 %v1310_v58, %v1093_v11  ;;  %v1100_v6 = vmul.f32 %v1844_v63, %v4174_v43  ;;  %v4279_v57 = vld [vmem:[#allocation129_spill] sm:$0xff] }
 0x142   :  { %v1317_v59 = vadd.f32 %v1316_v51, %v1098_v13  ;;  %1855 = vtanh.f32 %v657_v2  ;;  %v1101_v9 = vmul.f32 %v1846_v17, %v4176_v18  ;;  %v1325_v3 = vadd.f32 %v1324_v29, %v1105_v4  ;;  %v4280_v51 = vld [vmem:[#allocation131_spill] sm:$0xff]  ;;  %v4281_v58 = vld [vmem:[#allocation81_spill] sm:$0xff] }
 0x143   :  { %1857 = vtanh.f32 %v658_v37  ;;  %v1110_v30 = vmul.f32 %v4277_v46, %v2198_v27  ;;  %1312 = vadd.xlane.f32.xlu0 %v1311_v8  ;;  %v1111_v48 = vmul.f32 %v4278_v12, %v2200_v28  ;;  %v1112_v11 = vmul.f32 %v4279_v57, %v2202_v33  ;;  %v4282_v37 = vld [vmem:[#allocation89_spill] sm:$0xff] }
 0x144   :  { %v1318_v61 = vadd.f32 %v1317_v59, %v1099_v32  ;;  %1859 = vtanh.f32 %v659_v31  ;;  %v1113_v42 = vmul.f32 %v4280_v51, %v2204_v34  ;;  %v418_v4 = vmul.f32 %v2186_v14, %v4281_v58  ;;  %v4283_v32 = vld [vmem:[#allocation91_spill] sm:$0xff] }
 0x145   :  { %1861 = vtanh.f32 %v660_v52  ;;  %v419_v13 = vmul.f32 %v2188_v15, %v4281_v58  ;;  %v1332_v7 = vadd.f32 %v1111_v48, %v1110_v30  ;;  %v665_v63 = vadd.f32 %v2190_v19, %v4282_v37  ;;  %v4284_v59 = vld [vmem:[#allocation123_spill] sm:$0xff]  ;;  %v4285_v58 = vld [vmem:[#allocation125_spill] sm:$0xff]  ;;  %v4286_v37 = vld [vmem:[#allocation126_spill] sm:$0xff] }
 0x146   :  { %v1848_v36 = vpop.eup %1847  ;;  %v1319_v2 = vadd.f32 %v1318_v61, %v1100_v6  ;;  %v666_v29 = vadd.f32 %v2192_v20, %v4283_v32  ;;  %v667_v17 = vadd.f32 %v2194_v21, %v418_v4  ;;  %v1118_v46 = vmul.f32 %v4284_v59, %v2198_v27 }
 0x147   :  { %v1850_v31 = vpop.eup %1849  ;;  %v1106_v52 = vmul.f32 %v1848_v36, %v4170_v10  ;;  %v668_v8 = vadd.f32 %v2196_v26, %v419_v13  ;;  %v1333_v30 = vadd.f32 %v1332_v7, %v1112_v11  ;;  %1863 = vtanh.f32 %v665_v63  ;;  %v4287_v11 = vld [vmem:[#allocation52_spill] sm:$0xff] }
 0x148   :  { %v1852_v12 = vpop.eup %1851  ;;  %v1320_v57 = vadd.f32 %v1319_v2, %v1101_v9  ;;  %v1107_v6 = vmul.f32 %v1850_v31, %v4172_v54  ;;  %1865 = vtanh.f32 %v666_v29  ;;  %v1119_v36 = vmul.f32 %v4285_v58, %v2200_v28 }
 0x149   :  { %v1854_v61 = vpop.eup %1853  ;;  %v1108_v48 = vmul.f32 %v1852_v12, %v4174_v43  ;;  %v1326_v51 = vadd.f32 %v1325_v3, %v1106_v52  ;;  %v1334_v13 = vadd.f32 %v1333_v30, %v1113_v42  ;;  %1867 = vtanh.f32 %v667_v17  ;;  %v4288_v3 = vld [vmem:[#allocation105_spill] sm:$0xff]  ;;  %v4289_v52 = vld [vmem:[#allocation110_spill] sm:$0xff]  ;;  %v4290_v17 = vld [vmem:[#allocation111_spill] sm:$0xff] }
 0x14a   :  { %1321 = vadd.xlane.f32.xlu1 %v1320_v57  ;;  %v1109_v4 = vmul.f32 %v1854_v61, %v4176_v18  ;;  %v1120_v9 = vmul.f32 %v4286_v37, %v2202_v33  ;;  %1869 = vtanh.f32 %v668_v8  ;;  %v1121_v7 = vmul.f32 %v4287_v11, %v2204_v34 }
 0x14b   :  { %v1327_v2 = vadd.f32 %v1326_v51, %v1107_v6  ;;  %v1341_v63 = vadd.f32 %v1119_v36, %v1118_v46  ;;  %v426_v29 = vmul.f32 %v2186_v14, %v4288_v3  ;;  %v427_v31 = vmul.f32 %v2188_v15, %v4288_v3 }
 0x14c   :  { %v1856_v32 = vpop.eup %1855  ;;  %v673_v42 = vadd.f32 %v2190_v19, %v4289_v52  ;;  %v674_v59 = vadd.f32 %v2192_v20, %v4290_v17  ;;  %v1126_v46 = vmul.f32 %v3024_v44, %v2198_v27  ;;  %v1127_v44 = vmul.f32 %v3030_v38, %v2200_v28  ;;  %v4294_v17 = vld [vmem:[#allocation101_spill] sm:$0xff] }
 0x14d   :  { %v1858_v12 = vpop.eup %1857  ;;  %v1328_v57 = vadd.f32 %v1327_v2, %v1108_v48  ;;  %v1114_v8 = vmul.f32 %v1856_v32, %v4170_v10  ;;  %v1342_v6 = vadd.f32 %v1341_v63, %v1120_v9  ;;  %v675_v51 = vadd.f32 %v2194_v21, %v426_v29  ;;  %v4291_v9 = vld [vmem:[#allocation30_spill] sm:$0xff]  ;;  %v4292_v29 = vld [vmem:[#allocation31_spill] sm:$0xff] }
 0x14e   :  { %v1860_v30 = vpop.eup %1859  ;;  %v1115_v61 = vmul.f32 %v1858_v12, %v4172_v54  ;;  %v676_v58 = vadd.f32 %v2196_v26, %v427_v31  ;;  %1871 = vtanh.f32 %v673_v42  ;;  %v1128_v63 = vmul.f32 %v4291_v9, %v2202_v33 }
 0x14f   :  { %v1862_v36 = vpop.eup %1861  ;;  %v1329_v37 = vadd.f32 %v1328_v57, %v1109_v4  ;;  %v1116_v11 = vmul.f32 %v1860_v30, %v4174_v43  ;;  %v1335_v3 = vadd.f32 %v1334_v13, %v1114_v8  ;;  %v1343_v48 = vadd.f32 %v1342_v6, %v1121_v7  ;;  %v4293_v4 = vld [vmem:[#allocation94_spill] sm:$0xff] }
 0x150   :  { %v1117_v2 = vmul.f32 %v1862_v36, %v4176_v18  ;;  %1873 = vtanh.f32 %v674_v59  ;;  %v1129_v31 = vmul.f32 %v4292_v29, %v2204_v34  ;;  %v434_v52 = vmul.f32 %v2186_v14, %v4293_v4  ;;  %v4295_v8 = vld [vmem:[#allocation102_spill] sm:$0xff] }
 0x151   :  { %1330 = vadd.xlane.f32.xlu0 %v1329_v37  ;;  %v1336_v32 = vadd.f32 %v1335_v3, %v1115_v61  ;;  %1875 = vtanh.f32 %v675_v51  ;;  %v1864_v13 = vpop.eup %1863  ;;  %v1350_v7 = vadd.f32 %v1127_v44, %v1126_v46  ;;  %v435_v42 = vmul.f32 %v2188_v15, %v4293_v4 }
 0x152   :  { %1877 = vtanh.f32 %v676_v58  ;;  %v681_v38 = vadd.f32 %v2190_v19, %v4294_v17  ;;  %v1866_v59 = vpop.eup %1865  ;;  %v1122_v57 = vmul.f32 %v1864_v13, %v4170_v10  ;;  %v682_v6 = vadd.f32 %v2192_v20, %v4295_v8  ;;  %v4298_v13 = vld [vmem:[#allocation135_spill] sm:$0xff]  ;;  %v4300_v17 = vld [vmem:[#allocation124_spill] sm:$0xff] }
 0x153   :  { %v1337_v12 = vadd.f32 %v1336_v32, %v1116_v11  ;;  %v683_v30 = vadd.f32 %v2194_v21, %v434_v52  ;;  %v1868_v61 = vpop.eup %1867  ;;  %v1123_v51 = vmul.f32 %v1866_v59, %v4172_v54  ;;  %v1351_v58 = vadd.f32 %v1350_v7, %v1128_v63  ;;  %v4296_v32 = vld [vmem:[#allocation132_spill] sm:$0xff]  ;;  %v4297_v63 = vld [vmem:[#allocation133_spill] sm:$0xff]  ;;  %v4301_v59 = vld [vmem:[#allocation127_spill] sm:$0xff] }
 0x154   :  { %v684_v46 = vadd.f32 %v2196_v26, %v435_v42  ;;  %1879 = vtanh.f32 %v681_v38  ;;  %v1870_v36 = vpop.eup %1869  ;;  %v1124_v3 = vmul.f32 %v1868_v61, %v4174_v43  ;;  %v1344_v44 = vadd.f32 %v1343_v48, %v1122_v57  ;;  %v4299_v48 = vld [vmem:[#allocation137_spill] sm:$0xff] }
 0x155   :  { %v1338_v37 = vadd.f32 %v1337_v12, %v1117_v2  ;;  %1881 = vtanh.f32 %v682_v6  ;;  %v1125_v11 = vmul.f32 %v1870_v36, %v4176_v18  ;;  %v1352_v9 = vadd.f32 %v1351_v58, %v1129_v31 }
 0x156   :  { %1883 = vtanh.f32 %v683_v30  ;;  %v1134_v29 = vmul.f32 %v4296_v32, %v2198_v27  ;;  %v1345_v4 = vadd.f32 %v1344_v44, %v1123_v51  ;;  %v1135_v52 = vmul.f32 %v4297_v63, %v2200_v28  ;;  %v4302_v30 = vld [vmem:[#allocation130_spill] sm:$0xff] }
 0x157   :  { %1339 = vadd.xlane.f32.xlu1 %v1338_v37  ;;  %1885 = vtanh.f32 %v684_v46  ;;  %v1136_v2 = vmul.f32 %v4298_v13, %v2202_v33  ;;  %v1137_v42 = vmul.f32 %v4299_v48, %v2204_v34  ;;  %v442_v31 = vmul.f32 %v2186_v14, %v4300_v17  ;;  %v4303_v13 = vld [vmem:[#allocation38_spill] sm:$0xff] }
 0x158   :  { %v1872_v7 = vpop.eup %1871  ;;  %v443_v38 = vmul.f32 %v2188_v15, %v4300_v17  ;;  %v689_v12 = vadd.f32 %v2190_v19, %v4301_v59  ;;  %v1346_v57 = vadd.f32 %v1345_v4, %v1124_v3  ;;  %v1359_v6 = vadd.f32 %v1135_v52, %v1134_v29 }
 0x159   :  { %v1130_v8 = vmul.f32 %v1872_v7, %v4170_v10  ;;  %v690_v61 = vadd.f32 %v2192_v20, %v4302_v30  ;;  %v691_v58 = vadd.f32 %v2194_v21, %v442_v31  ;;  %v1142_v36 = vmul.f32 %v3146_v47, %v2198_v27 }
 0x15a   :  { %v1874_v51 = vpop.eup %1873  ;;  %v692_v46 = vadd.f32 %v2196_v26, %v443_v38  ;;  %1887 = vtanh.f32 %v689_v12  ;;  %v1347_v44 = vadd.f32 %v1346_v57, %v1125_v11  ;;  %v1360_v4 = vadd.f32 %v1359_v6, %v1136_v2  ;;  %v4305_v38 = vld [vmem:[#allocation108_spill] sm:$0xff] }
 0x15b   :  { %v1876_v37 = vpop.eup %1875  ;;  %v1131_v32 = vmul.f32 %v1874_v51, %v4172_v54  ;;  %v1353_v3 = vadd.f32 %v1352_v9, %v1130_v8  ;;  %1889 = vtanh.f32 %v690_v61  ;;  %v1143_v52 = vmul.f32 %v3152_v49, %v2200_v28  ;;  %v4304_v9 = vld [vmem:[#allocation39_spill] sm:$0xff]  ;;  %v4306_v6 = vld [vmem:[#allocation116_spill] sm:$0xff] }
 0x15c   :  { %v1878_v63 = vpop.eup %1877  ;;  %v1132_v29 = vmul.f32 %v1876_v37, %v4174_v43  ;;  %v1144_v7 = vmul.f32 %v4303_v13, %v2202_v33  ;;  %1348 = vadd.xlane.f32.xlu0 %v1347_v44  ;;  %v1361_v17 = vadd.f32 %v1360_v4, %v1137_v42  ;;  %1891 = vtanh.f32 %v691_v58  ;;  %v4307_v58 = vld [vmem:[#allocation117_spill] sm:$0xff] }
 0x15d   :  { %v1133_v48 = vmul.f32 %v1878_v63, %v4176_v18  ;;  %v1354_v47 = vadd.f32 %v1353_v3, %v1131_v32  ;;  %1893 = vtanh.f32 %v692_v46  ;;  %v1145_v2 = vmul.f32 %v4304_v9, %v2204_v34 }
 0x15e   :  { %v1880_v11 = vpop.eup %1879  ;;  %v1368_v31 = vadd.f32 %v1143_v52, %v1142_v36  ;;  %v450_v59 = vmul.f32 %v2186_v14, %v4305_v38  ;;  %v451_v8 = vmul.f32 %v2188_v15, %v4305_v38  ;;  %v697_v42 = vadd.f32 %v2190_v19, %v4306_v6  ;;  %v4308_v52 = vld [vmem:[#allocation26_spill] sm:$0xff] }
 0x15f   :  { %v1882_v12 = vpop.eup %1881  ;;  %v1355_v49 = vadd.f32 %v1354_v47, %v1132_v29  ;;  %v1138_v57 = vmul.f32 %v1880_v11, %v4170_v10  ;;  %v698_v46 = vadd.f32 %v2192_v20, %v4307_v58  ;;  %v1150_v13 = vmul.f32 %v4308_v52, %v2198_v27  ;;  %v4309_v47 = vld [vmem:[#allocation43_spill] sm:$0xff] }
 0x160   :  { %v1884_v30 = vpop.eup %1883  ;;  %v1139_v61 = vmul.f32 %v1882_v12, %v4172_v54  ;;  %v1369_v51 = vadd.f32 %v1368_v31, %v1144_v7  ;;  %v699_v36 = vadd.f32 %v2194_v21, %v450_v59  ;;  %v700_v4 = vadd.f32 %v2196_v26, %v451_v8  ;;  %v4312_v59 = vld [vmem:[#allocation32_spill] sm:$0xff] }
 0x161   :  { %v1886_v37 = vpop.eup %1885  ;;  %v1356_v44 = vadd.f32 %v1355_v49, %v1133_v48  ;;  %v1140_v32 = vmul.f32 %v1884_v30, %v4174_v43  ;;  %v1362_v3 = vadd.f32 %v1361_v17, %v1138_v57  ;;  %1895 = vtanh.f32 %v697_v42  ;;  %v4310_v48 = vld [vmem:[#allocation27_spill] sm:$0xff]  ;;  %v4311_v17 = vld [vmem:[#allocation45_spill] sm:$0xff]  ;;  %v4313_v42 = vld [vmem:[#allocation28_spill] sm:$0xff] }
 0x162   :  { %v1141_v63 = vmul.f32 %v1886_v37, %v4176_v18  ;;  %v1370_v29 = vadd.f32 %v1369_v51, %v1145_v2  ;;  %1897 = vtanh.f32 %v698_v46  ;;  %v1151_v11 = vmul.f32 %v4309_v47, %v2200_v28 }
 0x163   :  { %1357 = vadd.xlane.f32.xlu1 %v1356_v44  ;;  %v1363_v7 = vadd.f32 %v1362_v3, %v1139_v61  ;;  %v1152_v9 = vmul.f32 %v4310_v48, %v2202_v33  ;;  %1899 = vtanh.f32 %v699_v36  ;;  %v1153_v38 = vmul.f32 %v4311_v17, %v2204_v34  ;;  %v4314_v61 = vld [vmem:[#allocation48_spill] sm:$0xff] }
 0x164   :  { %v1888_v31 = vpop.eup %1887  ;;  %v458_v2 = vmul.f32 %v2186_v14, %v4312_v59  ;;  %v459_v12 = vmul.f32 %v2188_v15, %v4312_v59  ;;  %1901 = vtanh.f32 %v700_v4  ;;  %v1377_v8 = vadd.f32 %v1151_v11, %v1150_v13 }
 0x165   :  { %v1364_v49 = vadd.f32 %v1363_v7, %v1140_v32  ;;  %v1146_v57 = vmul.f32 %v1888_v31, %v4170_v10  ;;  %v1890_v6 = vpop.eup %1889  ;;  %v705_v30 = vadd.f32 %v2190_v19, %v4313_v42  ;;  %v706_v51 = vadd.f32 %v2192_v20, %v4314_v61 }
 0x166   :  { %v707_v58 = vadd.f32 %v2194_v21, %v458_v2  ;;  %v708_v46 = vadd.f32 %v2196_v26, %v459_v12  ;;  %v1892_v36 = vpop.eup %1891  ;;  %v1147_v44 = vmul.f32 %v1890_v6, %v4172_v54  ;;  %v1378_v3 = vadd.f32 %v1377_v8, %v1152_v9 }
 0x167   :  { %v1365_v37 = vadd.f32 %v1364_v49, %v1141_v63  ;;  %v1371_v32 = vadd.f32 %v1370_v29, %v1146_v57  ;;  %v1894_v52 = vpop.eup %1893  ;;  %v1148_v4 = vmul.f32 %v1892_v36, %v4174_v43  ;;  %1903 = vtanh.f32 %v705_v30  ;;  %v4317_v49 = vld [vmem:[#allocation136_spill] sm:$0xff]  ;;  %v4318_v57 = vld [vmem:[#allocation66_spill] sm:$0xff]  ;;  %v4319_v36 = vld [vmem:[#allocation67_spill] sm:$0xff] }
 0x168   :  { %v1158_v13 = vmul.f32 %v3236_v40, %v2198_v27  ;;  %v1159_v7 = vmul.f32 %v3243_v55, %v2200_v28  ;;  %v1149_v47 = vmul.f32 %v1894_v52, %v4176_v18  ;;  %v1379_v48 = vadd.f32 %v1378_v3, %v1153_v38  ;;  %v4315_v40 = vld [vmem:[#allocation128_spill] sm:$0xff]  ;;  %v4316_v38 = vld [vmem:[#allocation134_spill] sm:$0xff]  ;;  %v4320_v52 = vld [vmem:[#allocation69_spill] sm:$0xff] }
 0x169   :  { %1366 = vadd.xlane.f32.xlu0 %v1365_v37  ;;  %v1372_v11 = vadd.f32 %v1371_v32, %v1147_v44  ;;  %1905 = vtanh.f32 %v706_v51  ;;  %v1160_v63 = vmul.f32 %v3252_v16, %v2202_v33  ;;  %v1161_v29 = vmul.f32 %v3260_v23, %v2204_v34 }
 0x16a   :  { %1907 = vtanh.f32 %v707_v58  ;;  %v1386_v9 = vadd.f32 %v1159_v7, %v1158_v13  ;;  %v466_v17 = vmul.f32 %v2186_v14, %v4315_v40  ;;  %v467_v55 = vmul.f32 %v2188_v15, %v4315_v40  ;;  %v4321_v7 = vld [vmem:[#allocation71_spill] sm:$0xff] }
 0x16b   :  { %v1373_v31 = vadd.f32 %v1372_v11, %v1148_v4  ;;  %1909 = vtanh.f32 %v708_v46  ;;  %v1896_v59 = vpop.eup %1895  ;;  %v713_v12 = vadd.f32 %v2190_v19, %v4316_v38  ;;  %v714_v16 = vadd.f32 %v2192_v20, %v4317_v49 }
 0x16c   :  { %v1387_v2 = vadd.f32 %v1386_v9, %v1160_v63  ;;  %v1166_v23 = vmul.f32 %v4318_v57, %v2198_v27  ;;  %v1898_v8 = vpop.eup %1897  ;;  %v1154_v42 = vmul.f32 %v1896_v59, %v4170_v10  ;;  %v715_v30 = vadd.f32 %v2194_v21, %v466_v17  ;;  %v4322_v17 = vld [vmem:[#allocation35_spill] sm:$0xff] }
 0x16d   :  { %v1374_v6 = vadd.f32 %v1373_v31, %v1149_v47  ;;  %v716_v61 = vadd.f32 %v2196_v26, %v467_v55  ;;  %v1900_v51 = vpop.eup %1899  ;;  %v1155_v58 = vmul.f32 %v1898_v8, %v4172_v54  ;;  %1911 = vtanh.f32 %v713_v12 }
 0x16e   :  { %v1388_v46 = vadd.f32 %v1387_v2, %v1161_v29  ;;  %v1167_v37 = vmul.f32 %v4319_v36, %v2200_v28  ;;  %v1902_v44 = vpop.eup %1901  ;;  %v1156_v32 = vmul.f32 %v1900_v51, %v4174_v43  ;;  %v1380_v3 = vadd.f32 %v1379_v48, %v1154_v42 }
 0x16f   :  { %1375 = vadd.xlane.f32.xlu1 %v1374_v6  ;;  %1913 = vtanh.f32 %v714_v16  ;;  %v1168_v4 = vmul.f32 %v4320_v52, %v2202_v33  ;;  %v1157_v13 = vmul.f32 %v1902_v44, %v4176_v18  ;;  %v1169_v47 = vmul.f32 %v4321_v7, %v2204_v34  ;;  %v4325_v52 = vld [vmem:[#allocation34_spill] sm:$0xff] }
 0x170   :  { %1915 = vtanh.f32 %v715_v30  ;;  %v1395_v11 = vadd.f32 %v1167_v37, %v1166_v23  ;;  %v1381_v63 = vadd.f32 %v1380_v3, %v1155_v58  ;;  %v474_v29 = vmul.f32 %v2186_v14, %v3214_v50 }
 0x171   :  { %1917 = vtanh.f32 %v716_v61  ;;  %v475_v9 = vmul.f32 %v2188_v15, %v3214_v50  ;;  %v1904_v48 = vpop.eup %1903  ;;  %v721_v40 = vadd.f32 %v2190_v19, %v3248_v35  ;;  %v722_v55 = vadd.f32 %v2192_v20, %v4322_v17 }
 0x172   :  { %v1396_v31 = vadd.f32 %v1395_v11, %v1168_v4  ;;  %v1174_v59 = vmul.f32 %v3324_v56, %v2198_v27  ;;  %v1382_v38 = vadd.f32 %v1381_v63, %v1156_v32  ;;  %v1162_v12 = vmul.f32 %v1904_v48, %v4170_v10  ;;  %v4324_v32 = vld [vmem:[#allocation49_spill] sm:$0xff]  ;;  %v4326_v4 = vld [vmem:[#allocation36_spill] sm:$0xff] }
 0x173   :  { %v1906_v2 = vpop.eup %1905  ;;  %v723_v49 = vadd.f32 %v2194_v21, %v474_v29  ;;  %v724_v16 = vadd.f32 %v2196_v26, %v475_v9  ;;  %1919 = vtanh.f32 %v721_v40  ;;  %v1175_v35 = vmul.f32 %v3329_v39, %v2200_v28  ;;  %v4323_v39 = vld [vmem:[#allocation29_spill] sm:$0xff] }
 0x174   :  { %v1908_v50 = vpop.eup %1907  ;;  %v1163_v57 = vmul.f32 %v1906_v2, %v4172_v54  ;;  %v1397_v23 = vadd.f32 %v1396_v31, %v1169_v47  ;;  %v1383_v6 = vadd.f32 %v1382_v38, %v1157_v13  ;;  %v1389_v42 = vadd.f32 %v1388_v46, %v1162_v12  ;;  %v4327_v31 = vld [vmem:[#allocation57_spill] sm:$0xff] }
 0x175   :  { %v1910_v8 = vpop.eup %1909  ;;  %v1164_v56 = vmul.f32 %v1908_v50, %v4174_v43  ;;  %1921 = vtanh.f32 %v722_v55  ;;  %v1176_v61 = vmul.f32 %v3335_v60, %v2202_v33  ;;  %v1177_v51 = vmul.f32 %v3341_v41, %v2204_v34  ;;  %v4329_v50 = vld [vmem:[#allocation40_spill] sm:$0xff] }
 0x176   :  { %v1165_v30 = vmul.f32 %v1910_v8, %v4176_v18  ;;  %1923 = vtanh.f32 %v723_v49  ;;  %1384 = vadd.xlane.f32.xlu0 %v1383_v6  ;;  %v1390_v58 = vadd.f32 %v1389_v42, %v1163_v57  ;;  %v1404_v36 = vadd.f32 %v1175_v35, %v1174_v59  ;;  %v4328_v49 = vld [vmem:[#allocation61_spill] sm:$0xff] }
 0x177   :  { %1925 = vtanh.f32 %v724_v16  ;;  %v482_v37 = vmul.f32 %v2186_v14, %v4323_v39  ;;  %v1912_v44 = vpop.eup %1911  ;;  %v483_v46 = vmul.f32 %v2188_v15, %v4323_v39  ;;  %v729_v3 = vadd.f32 %v2190_v19, %v4324_v32 }
 0x178   :  { %v730_v60 = vadd.f32 %v2192_v20, %v4325_v52  ;;  %v1182_v41 = vmul.f32 %v4326_v4, %v2198_v27  ;;  %v1391_v7 = vadd.f32 %v1390_v58, %v1164_v56  ;;  %v1170_v47 = vmul.f32 %v1912_v44, %v4170_v10 }
 0x179   :  { %v1914_v13 = vpop.eup %1913  ;;  %v1405_v11 = vadd.f32 %v1404_v36, %v1176_v61  ;;  %v731_v63 = vadd.f32 %v2194_v21, %v482_v37  ;;  %v732_v48 = vadd.f32 %v2196_v26, %v483_v46  ;;  %1927 = vtanh.f32 %v729_v3 }
 0x17a   :  { %v1916_v29 = vpop.eup %1915  ;;  %v1171_v9 = vmul.f32 %v1914_v13, %v4172_v54  ;;  %v1183_v40 = vmul.f32 %v4327_v31, %v2200_v28  ;;  %v1392_v55 = vadd.f32 %v1391_v7, %v1165_v30  ;;  %v1398_v2 = vadd.f32 %v1397_v23, %v1170_v47  ;;  %v4330_v7 = vld [vmem:[#allocation33_spill] sm:$0xff] }
 0x17b   :  { %v1918_v17 = vpop.eup %1917  ;;  %v1172_v59 = vmul.f32 %v1916_v29, %v4174_v43  ;;  %v1406_v38 = vadd.f32 %v1405_v11, %v1177_v51  ;;  %1929 = vtanh.f32 %v730_v60  ;;  %v1184_v16 = vmul.f32 %v4328_v49, %v2202_v33  ;;  %v1214_v11 = vpop.xlane.xlu0 %1213 }
 0x17c   :  { %v1173_v12 = vmul.f32 %v1918_v17, %v4176_v18  ;;  %v1185_v57 = vmul.f32 %v4329_v50, %v2204_v34  ;;  %1393 = vadd.xlane.f32.xlu1 %v1392_v55  ;;  %v1399_v35 = vadd.f32 %v1398_v2, %v1171_v9  ;;  %1931 = vtanh.f32 %v731_v63  ;;  %v4331_v9 = vld [vmem:[#allocation60_spill] sm:$0xff] }
 0x17d   :  { %v1413_v8 = vadd.f32 %v1183_v40, %v1182_v41  ;;  %v490_v6 = vmul.f32 %v2186_v14, %v3333_v22  ;;  %v1920_v56 = vpop.eup %1919  ;;  %1933 = vtanh.f32 %v732_v48  ;;  %v491_v23 = vmul.f32 %v2188_v15, %v3333_v22  ;;  %v4332_v40 = vld [vmem:[#allocation63_spill] sm:$0xff] }
 0x17e   :  { %v737_v42 = vadd.f32 %v2190_v19, %v3365_v45  ;;  %v738_v30 = vadd.f32 %v2192_v20, %v3369_v5  ;;  %v1400_v51 = vadd.f32 %v1399_v35, %v1172_v59  ;;  %v1178_v58 = vmul.f32 %v1920_v56, %v4170_v10 }
 0x17f   :  { %v1922_v61 = vpop.eup %1921  ;;  %v1414_v36 = vadd.f32 %v1413_v8, %v1184_v16  ;;  %v739_v39 = vadd.f32 %v2194_v21, %v490_v6  ;;  %v740_v46 = vadd.f32 %v2196_v26, %v491_v23  ;;  %v1190_v22 = vmul.f32 %v3412_v1, %v2198_v27  ;;  %v4333_v16 = vld [vmem:[#allocation23_spill] sm:$0xff]  ;;  %v4336_v23 = vld [vmem:[#allocation46_spill] sm:$0xff] }
 0x180   :  { %v1924_v37 = vpop.eup %1923  ;;  %v1179_v44 = vmul.f32 %v1922_v61, %v4172_v54  ;;  %1935 = vtanh.f32 %v737_v42  ;;  %v1401_v32 = vadd.f32 %v1400_v51, %v1173_v12  ;;  %v1407_v3 = vadd.f32 %v1406_v38, %v1178_v58 }
 0x181   :  { %v1926_v45 = vpop.eup %1925  ;;  %v1180_v5 = vmul.f32 %v1924_v37, %v4174_v43  ;;  %v1415_v52 = vadd.f32 %v1414_v36, %v1185_v57  ;;  %1937 = vtanh.f32 %v738_v30  ;;  %v1191_v4 = vmul.f32 %v3417_v0, %v2200_v28 }
 0x182   :  { %v1181_v60 = vmul.f32 %v1926_v45, %v4176_v18  ;;  %v1192_v41 = vmul.f32 %v3423_v53, %v2202_v33  ;;  %1402 = vadd.xlane.f32.xlu0 %v1401_v32  ;;  %v1408_v13 = vadd.f32 %v1407_v3, %v1179_v44  ;;  %1939 = vtanh.f32 %v739_v39 }
 0x183   :  { %v1193_v1 = vmul.f32 %v3431_v24, %v2204_v34  ;;  %v498_v47 = vmul.f32 %v2186_v14, %v4330_v7  ;;  %v1928_v63 = vpop.eup %1927  ;;  %1941 = vtanh.f32 %v740_v46  ;;  %v1422_v29 = vadd.f32 %v1191_v4, %v1190_v22  ;;  %v4338_v46 = vld [vmem:[#allocation25_spill] sm:$0xff] }
 0x184   :  { %v499_v0 = vmul.f32 %v2188_v15, %v4330_v7  ;;  %v745_v53 = vadd.f32 %v2190_v19, %v4331_v9  ;;  %v1409_v48 = vadd.f32 %v1408_v13, %v1180_v5  ;;  %v1186_v31 = vmul.f32 %v1928_v63, %v4170_v10 }
 0x185   :  { %v746_v17 = vadd.f32 %v2192_v20, %v4332_v40  ;;  %v747_v24 = vadd.f32 %v2194_v21, %v498_v47  ;;  %v1930_v55 = vpop.eup %1929  ;;  %v1423_v14 = vadd.f32 %v1422_v29, %v1192_v41  ;;  %v1198_v2 = vmul.f32 %v3347_v62, %v2198_v27  ;;  %v4334_v20 = vld [vmem:[#allocation22_spill] sm:$0xff]  ;;  %v4335_v21 = vld [vmem:[#allocation24_spill] sm:$0xff] }
 0x186   :  { %v748_v59 = vadd.f32 %v2196_v26, %v499_v0  ;;  %1943 = vtanh.f32 %v745_v53  ;;  %v1932_v15 = vpop.eup %1931  ;;  %v1410_v38 = vadd.f32 %v1409_v48, %v1181_v60  ;;  %v1187_v19 = vmul.f32 %v1930_v55, %v4172_v54  ;;  %v1951_v53 = vld [vmem:[%s3977_s2 + $0x18] sm:$0xff]  ;;  %v4339_v48 = vld [vmem:[#allocation5_spill] sm:$0xff] }
 0x187   :  { %v1416_v12 = vadd.f32 %v1415_v52, %v1186_v31  ;;  %1945 = vtanh.f32 %v746_v17  ;;  %v1934_v49 = vpop.eup %1933  ;;  %v86_v50 = vadd.f32 %v4334_v20, %v4333_v16  ;;  %v84_v57 = vadd.f32 %v4334_v20, %v4335_v21  ;;  %v1232_v6 = vpop.xlane.xlu0 %1231 }
 0x188   :  { %1947 = vtanh.f32 %v747_v24  ;;  %v1199_v26 = vmul.f32 %v3355_v25, %v2200_v28  ;;  %1411 = vadd.xlane.f32.xlu1 %v1410_v38  ;;  %v1188_v27 = vmul.f32 %v1932_v15, %v4174_v43  ;;  %v1189_v62 = vmul.f32 %v1934_v49, %v4176_v18  ;;  %v4337_v28 = vld [vmem:[#allocation47_spill] sm:$0xff] }
 0x189   :  { %v1417_v35 = vadd.f32 %v1416_v12, %v1187_v19  ;;  %v1424_v8 = vadd.f32 %v1423_v14, %v1193_v1  ;;  %1949 = vtanh.f32 %v748_v59  ;;  %v1200_v42 = vmul.f32 %v4336_v23, %v2202_v33  ;;  %v1952_v59 = vld [vmem:[%s3977_s2 + $0x20] sm:$0xff] }
 0x18a   :  { %v1936_v56 = vpop.eup %1935  ;;  %v1431_v30 = vadd.f32 %v1199_v26, %v1198_v2  ;;  %v3764_v61 = vstv %s3735_s1  ;;  %v1201_v25 = vmul.f32 %v4337_v28, %v2204_v34  ;;  %v85_v22 = vadd.f32 %v4334_v20, %v4338_v46 }
 0x18b   :  { %v1418_v51 = vadd.f32 %v1417_v35, %v1188_v27  ;;  %v1194_v58 = vmul.f32 %v1936_v56, %v4170_v10  ;;  %v1441_v36 = vadd.f32 %v3764_v61, %v1214_v11  ;;  %v1938_v39 = vpop.eup %1937  ;;  %v1223_v44 = vpop.xlane.xlu1 %1222  ;;  %v1443_v33 = vadd.f32 %v3764_v61, %v1232_v6  ;;  %v1954_v27 = vld [vmem:[%s3977_s2 + $0x30] sm:$0xff] }
 0x18c   :  { %v1432_v37 = vadd.f32 %v1431_v30, %v1200_v42  ;;  %v1940_v45 = vpop.eup %1939  ;;  %v1195_v5 = vmul.f32 %v1938_v39, %v4172_v54  ;;  %v1442_v34 = vadd.f32 %v3764_v61, %v1223_v44  ;;  %v60_v31 = vmul.f32 %v1951_v53, %v4339_v48  ;;  %v4342_v53 = vld [vmem:[#allocation9_spill] sm:$0xff] }
 0x18d   :  { %v1419_v32 = vadd.f32 %v1418_v51, %v1189_v62  ;;  %v1425_v3 = vadd.f32 %v1424_v8, %v1194_v58  ;;  %v1467_v52 = vadd.f32 %v1441_v36, %v84_v57  ;;  %v1942_v60 = vpop.eup %1941  ;;  %v1469_v4 = vadd.f32 %v1443_v33, %v86_v50  ;;  %v1953_v57 = vld [vmem:[%s3977_s2 + $0x28] sm:$0xff]  ;;  %v1955_v58 = vld [vmem:[%s3977_s2 + $0x38] sm:$0xff] }
 0x18e   :  { %v1196_v41 = vmul.f32 %v1940_v45, %v4174_v43  ;;  %v1433_v1 = vadd.f32 %v1432_v37, %v1201_v25  ;;  %v1468_v47 = vadd.f32 %v1442_v34, %v85_v22  ;;  %v1197_v63 = vmul.f32 %v1942_v60, %v4176_v18  ;;  %v1956_v25 = vld [vmem:[%s3977_s2 + $0x40] sm:$0xff] }
 0x18f   :  { %1420 = vadd.xlane.f32.xlu0 %v1419_v32  ;;  %v1426_v13 = vadd.f32 %v1425_v3, %v1195_v5  ;;  %1494 = vst.msk [vmem:[%s3978_s3] sm:$0xff] %vm1493_vm0, %v1467_v52  ;;  %1496 = vst.msk [vmem:[%s3978_s3 + $0x10] sm:$0xff] %vm1493_vm0, %v1469_v4  ;;  %v61_v2 = vmul.f32 %v1952_v59, %v4339_v48  ;;  %v87_v19 = vadd.f32 %v4334_v20, %v60_v31  ;;  %v1957_v5 = vld [vmem:[%s3977_s2 + $0x48] sm:$0xff] }
 0x190   :  { %v1944_v7 = vpop.eup %1943  ;;  %1495 = vst.msk [vmem:[%s3978_s3 + $0x8] sm:$0xff] %vm1493_vm0, %v1468_v47  ;;  %v62_v26 = vmul.f32 %v1953_v57, %v4339_v48  ;;  %v63_v62 = vmul.f32 %v1954_v27, %v4339_v48  ;;  %v64_v28 = vmul.f32 %v1955_v58, %v4339_v48  ;;  %v65_v36 = vmul.f32 %v1956_v25, %v4339_v48 }
 0x191   :  { %v1946_v11 = vpop.eup %1945  ;;  %v1427_v29 = vadd.f32 %v1426_v13, %v1196_v41  ;;  %v1202_v0 = vmul.f32 %v1944_v7, %v4170_v10  ;;  %v88_v16 = vadd.f32 %v4334_v20, %v61_v2  ;;  %v66_v3 = vmul.f32 %v1957_v5, %v4339_v48  ;;  %v4340_v41 = vld [vmem:[#allocation7_spill] sm:$0xff] }
 0x192   :  { %v1948_v9 = vpop.eup %1947  ;;  %v1203_v17 = vmul.f32 %v1946_v11, %v4172_v54  ;;  %v89_v35 = vadd.f32 %v4334_v20, %v62_v26  ;;  %v90_v56 = vadd.f32 %v4334_v20, %v63_v62  ;;  %v91_v39 = vadd.f32 %v4334_v20, %v64_v28  ;;  %v4341_v11 = vld [vmem:[#allocation6_spill] sm:$0xff]  ;;  %v4344_v2 = vld [vmem:[#allocation11_spill] sm:$0xff]  ;;  %v4347_v62 = vld [vmem:[#allocation12_spill] sm:$0xff] }
 0x193   :  { %v1428_v40 = vadd.f32 %v1427_v29, %v1197_v63  ;;  %v1434_v24 = vadd.f32 %v1433_v1, %v1202_v0  ;;  %v1950_v55 = vpop.eup %1949  ;;  %v1204_v10 = vmul.f32 %v1948_v9, %v4174_v43  ;;  %v92_v46 = vadd.f32 %v4334_v20, %v65_v36  ;;  %v4349_v28 = vld [vmem:[#allocation14_spill] sm:$0xff] }
 0x194   :  { %v1205_v15 = vmul.f32 %v1950_v55, %v4176_v18  ;;  %v93_v52 = vadd.f32 %v4334_v20, %v66_v3  ;;  %v94_v13 = vadd.f32 %v4334_v20, %v4340_v41  ;;  %v95_v63 = vadd.f32 %v4334_v20, %v4341_v11 }
 0x195   :  { %1429 = vadd.xlane.f32.xlu1 %v1428_v40  ;;  %v1435_v14 = vadd.f32 %v1434_v24, %v1203_v17  ;;  %v96_v48 = vadd.f32 %v4334_v20, %v4342_v53  ;;  %v4343_v24 = vld [vmem:[#allocation8_spill] sm:$0xff]  ;;  %v103_v25 = vadd.f32 %v4334_v20, %v4349_v28 }
 0x196   :  { %v97_v55 = vadd.f32 %v4334_v20, %v4343_v24 }
 0x197   :  { %v1436_v38 = vadd.f32 %v1435_v14, %v1204_v10  ;;  %v1241_v12 = vpop.xlane.xlu0 %1240 }
 0x198   :  { %v1444_v54 = vadd.f32 %v3764_v61, %v1241_v12 }
 0x199   :  { %v1437_v49 = vadd.f32 %v1436_v38, %v1205_v15  ;;  %v98_v15 = vadd.f32 %v4334_v20, %v4344_v2 }
 0x19a   :  { %v1470_v43 = vadd.f32 %v1444_v54, %v87_v19 }
 0x19b   :  { %1438 = vadd.xlane.f32.xlu0 %v1437_v49  ;;  %v1250_v50 = vpop.xlane.xlu1 %1249  ;;  %v4345_v49 = vld [vmem:[#allocation10_spill] sm:$0xff] }
 0x19c   :  { %v1445_v21 = vadd.f32 %v3764_v61, %v1250_v50  ;;  %1497 = vst.msk [vmem:[%s3978_s3 + $0x18] sm:$0xff] %vm1493_vm0, %v1470_v43  ;;  %v99_v54 = vadd.f32 %v4334_v20, %v4345_v49 }
 0x19e   :  { %v1471_v18 = vadd.f32 %v1445_v21, %v88_v16  ;;  %v4346_v21 = vld [vmem:[#allocation13_spill] sm:$0xff] }
 0x1a0   :  { %1498 = vst.msk [vmem:[%s3978_s3 + $0x20] sm:$0xff] %vm1493_vm0, %v1471_v18  ;;  %v100_v18 = vadd.f32 %v4334_v20, %v4346_v21 }
 0x1a7   :  { %v1259_v8 = vpop.xlane.xlu0 %1258 }
 0x1a8   :  { %v1446_v6 = vadd.f32 %v3764_v61, %v1259_v8 }
 0x1aa   :  { %v1472_v23 = vadd.f32 %v1446_v6, %v89_v35  ;;  %v101_v35 = vadd.f32 %v4334_v20, %v4347_v62 }
 0x1ab   :  { %v1268_v42 = vpop.xlane.xlu1 %1267 }
 0x1ac   :  { %v1447_v30 = vadd.f32 %v3764_v61, %v1268_v42  ;;  %1499 = vst.msk [vmem:[%s3978_s3 + $0x28] sm:$0xff] %vm1493_vm0, %v1472_v23  ;;  %v4348_v23 = vld [vmem:[#allocation15_spill] sm:$0xff] }
 0x1ad   :  { %v102_v42 = vadd.f32 %v4334_v20, %v4348_v23 }
 0x1ae   :  { %v1473_v51 = vadd.f32 %v1447_v30, %v90_v56 }
 0x1b0   :  { %1500 = vst.msk [vmem:[%s3978_s3 + $0x30] sm:$0xff] %vm1493_vm0, %v1473_v51 }
 0x1b7   :  { %v1277_v37 = vpop.xlane.xlu0 %1276 }
 0x1b8   :  { %v1448_v44 = vadd.f32 %v3764_v61, %v1277_v37 }
 0x1ba   :  { %v1474_v22 = vadd.f32 %v1448_v44, %v91_v39  ;;  %v4350_v44 = vld [vmem:[#allocation17_spill] sm:$0xff] }
 0x1bc   :  { %v1286_v33 = vpop.xlane.xlu1 %1285  ;;  %1501 = vst.msk [vmem:[%s3978_s3 + $0x38] sm:$0xff] %vm1493_vm0, %v1474_v22 }
 0x1bd   :  { %v1449_v45 = vadd.f32 %v3764_v61, %v1286_v33 }
 0x1bf   :  { %v1475_v32 = vadd.f32 %v1449_v45, %v92_v46  ;;  %v104_v46 = vadd.f32 %v4334_v20, %v4350_v44 }
 0x1c1   :  { %1502 = vst.msk [vmem:[%s3978_s3 + $0x40] sm:$0xff] %vm1493_vm0, %v1475_v32  ;;  %v4351_v32 = vld [vmem:[#allocation16_spill] sm:$0xff] }
 0x1c2   :  { %v105_v5 = vadd.f32 %v4334_v20, %v4351_v32 }
 0x1c6   :  { %v1295_v60 = vpop.xlane.xlu0 %1294 }
 0x1c7   :  { %v1450_v34 = vadd.f32 %v3764_v61, %v1295_v60 }
 0x1c9   :  { %v1476_v4 = vadd.f32 %v1450_v34, %v93_v52  ;;  %v4352_v34 = vld [vmem:[#allocation19_spill] sm:$0xff] }
 0x1cb   :  { %1503 = vst.msk [vmem:[%s3978_s3 + $0x48] sm:$0xff] %vm1493_vm0, %v1476_v4  ;;  %v106_v4 = vadd.f32 %v4334_v20, %v4352_v34 }
 0x1cc   :  { %v1304_v1 = vpop.xlane.xlu1 %1303 }
 0x1cd   :  { %v1451_v7 = vadd.f32 %v3764_v61, %v1304_v1 }
 0x1cf   :  { %v1477_v47 = vadd.f32 %v1451_v7, %v94_v13  ;;  %v4353_v7 = vld [vmem:[#allocation18_spill] sm:$0xff] }
 0x1d0   :  { %v1313_v29 = vpop.xlane.xlu0 %1312 }
 0x1d1   :  { %1504 = vst.msk [vmem:[%s3978_s3 + $0x50] sm:$0xff] %vm1493_vm0, %v1477_v47  ;;  %v1452_v0 = vadd.f32 %v3764_v61, %v1313_v29  ;;  %v107_v47 = vadd.f32 %v4334_v20, %v4353_v7 }
 0x1d3   :  { %v1478_v9 = vadd.f32 %v1452_v0, %v95_v63  ;;  %v4354_v0 = vld [vmem:[#allocation21_spill] sm:$0xff] }
 0x1d5   :  { %1505 = vst.msk [vmem:[%s3978_s3 + $0x58] sm:$0xff] %vm1493_vm0, %v1478_v9  ;;  %v108_v9 = vadd.f32 %v4334_v20, %v4354_v0 }
 0x1d7   :  { %v1322_v31 = vpop.xlane.xlu1 %1321 }
 0x1d8   :  { %v1453_v40 = vadd.f32 %v3764_v61, %v1322_v31 }
 0x1da   :  { %v1479_v17 = vadd.f32 %v1453_v40, %v96_v48  ;;  %v4355_v40 = vld [vmem:[#allocation20_spill] sm:$0xff] }
 0x1dc   :  { %1506 = vst.msk [vmem:[%s3978_s3 + $0x60] sm:$0xff] %vm1493_vm0, %v1479_v17  ;;  %v109_v17 = vadd.f32 %v4334_v20, %v4355_v40 }
 0x1de   :  { %v1331_v10 = vpop.xlane.xlu0 %1330 }
 0x1df   :  { %v1454_v14 = vadd.f32 %v3764_v61, %v1331_v10 }
 0x1e1   :  { %v1480_v59 = vadd.f32 %v1454_v14, %v97_v55 }
 0x1e3   :  { %1507 = vst.msk [vmem:[%s3978_s3 + $0x68] sm:$0xff] %vm1493_vm0, %v1480_v59 }
 0x1e4   :  { %v1340_v38 = vpop.xlane.xlu1 %1339 }
 0x1e5   :  { %v1455_v19 = vadd.f32 %v3764_v61, %v1340_v38 }
 0x1e7   :  { %v1481_v12 = vadd.f32 %v1455_v19, %v98_v15 }
 0x1e9   :  { %1508 = vst.msk [vmem:[%s3978_s3 + $0x70] sm:$0xff] %vm1493_vm0, %v1481_v12  ;;  %v1349_v16 = vpop.xlane.xlu0 %1348 }
 0x1ea   :  { %v1456_v43 = vadd.f32 %v3764_v61, %v1349_v16 }
 0x1ec   :  { %v1482_v50 = vadd.f32 %v1456_v43, %v99_v54 }
 0x1ee   :  { %1509 = vst.msk [vmem:[%s3978_s3 + $0x78] sm:$0xff] %vm1493_vm0, %v1482_v50 }
 0x1f0   :  { %v1358_v57 = vpop.xlane.xlu1 %1357 }
 0x1f1   :  { %v1457_v26 = vadd.f32 %v3764_v61, %v1358_v57 }
 0x1f3   :  { %v1483_v27 = vadd.f32 %v1457_v26, %v100_v18 }
 0x1f5   :  { %1510 = vst.msk [vmem:[%s3978_s3 + $0x80] sm:$0xff] %vm1493_vm0, %v1483_v27 }
 0x1f6   :  { %v1367_v8 = vpop.xlane.xlu0 %1366 }
 0x1f7   :  { %v1458_v6 = vadd.f32 %v3764_v61, %v1367_v8 }
 0x1f9   :  { %v1484_v56 = vadd.f32 %v1458_v6, %v101_v35 }
 0x1fb   :  { %1511 = vst.msk [vmem:[%s3978_s3 + $0x88] sm:$0xff] %vm1493_vm0, %v1484_v56 }
 0x1fc   :  { %v1376_v30 = vpop.xlane.xlu1 %1375 }
 0x1fd   :  { %v1459_v51 = vadd.f32 %v3764_v61, %v1376_v30 }
 0x1ff   :  { %v1485_v58 = vadd.f32 %v1459_v51, %v102_v42 }
 0x201   :  { %1512 = vst.msk [vmem:[%s3978_s3 + $0x90] sm:$0xff] %vm1493_vm0, %v1485_v58 }
 0x203   :  { %v1385_v36 = vpop.xlane.xlu0 %1384 }
 0x204   :  { %v1460_v39 = vadd.f32 %v3764_v61, %v1385_v36 }
 0x206   :  { %v1486_v37 = vadd.f32 %v1460_v39, %v103_v25 }
 0x208   :  { %1513 = vst.msk [vmem:[%s3978_s3 + $0x98] sm:$0xff] %vm1493_vm0, %v1486_v37 }
 0x209   :  { %v1394_v22 = vpop.xlane.xlu1 %1393 }
 0x20a   :  { %v1461_v33 = vadd.f32 %v3764_v61, %v1394_v22 }
 0x20c   :  { %v1487_v45 = vadd.f32 %v1461_v33, %v104_v46 }
 0x20e   :  { %1514 = vst.msk [vmem:[%s3978_s3 + $0xa0] sm:$0xff] %vm1493_vm0, %v1487_v45 }
 0x20f   :  { %v1403_v3 = vpop.xlane.xlu0 %1402 }
 0x210   :  { %v1462_v52 = vadd.f32 %v3764_v61, %v1403_v3 }
 0x212   :  { %v1488_v60 = vadd.f32 %v1462_v52, %v105_v5 }
 0x214   :  { %1515 = vst.msk [vmem:[%s3978_s3 + $0xa8] sm:$0xff] %vm1493_vm0, %v1488_v60 }
 0x215   :  { %v1412_v41 = vpop.xlane.xlu1 %1411 }
 0x216   :  { %v1463_v13 = vadd.f32 %v3764_v61, %v1412_v41 }
 0x218   :  { %v1489_v1 = vadd.f32 %v1463_v13, %v106_v4 }
 0x21a   :  { %1516 = vst.msk [vmem:[%s3978_s3 + $0xb0] sm:$0xff] %vm1493_vm0, %v1489_v1 }
 0x21c   :  { %v1421_v11 = vpop.xlane.xlu0 %1420 }
 0x21d   :  { %v1464_v63 = vadd.f32 %v3764_v61, %v1421_v11 }
 0x21f   :  { %v1490_v29 = vadd.f32 %v1464_v63, %v107_v47 }
 0x221   :  { %1517 = vst.msk [vmem:[%s3978_s3 + $0xb8] sm:$0xff] %vm1493_vm0, %v1490_v29 }
 0x222   :  { %v1430_v53 = vpop.xlane.xlu1 %1429 }
 0x223   :  { %v1465_v48 = vadd.f32 %v3764_v61, %v1430_v53 }
 0x225   :  { %v1491_v31 = vadd.f32 %v1465_v48, %v108_v9 }
 0x227   :  { %1518 = vst.msk [vmem:[%s3978_s3 + $0xc0] sm:$0xff] %vm1493_vm0, %v1491_v31 }
 0x228   :  { %v1439_v24 = vpop.xlane.xlu0 %1438 }
 0x229   :  { %v1466_v55 = vadd.f32 %v3764_v61, %v1439_v24 }
 0x22b   :  { %v1492_v10 = vadd.f32 %v1466_v55, %v109_v17 }
 0x22d   :  { %1519 = vst.msk [vmem:[%s3978_s3 + $0xc8] sm:$0xff] %vm1493_vm0, %v1492_v10 }
 0x22e   :  { %1524 = vsyncpa [#allocation3], 1 }

</bundles_post_ra>
